<compile_context>
chip_gen: v7x
topology: tpu7x:2x2x1
jax: 0.10.0
libtpu: 0.0.40
codegen_flags: <defaults>
</compile_context>

<pallas_src>
import math

import jax
import jax.numpy as jnp
from jax.experimental import pallas as pl
from jax.experimental.pallas import tpu as pltpu

D_MODEL = 32
N_HEADS = 4
D_K = D_MODEL // N_HEADS
D_FF = 64
LN_EPS = 1e-6

VMEM_SPEC = pl.BlockSpec(memory_space=pltpu.MemorySpace.VMEM)
SMEM_SPEC = pl.BlockSpec(memory_space=pltpu.MemorySpace.SMEM)


# ---------------------------------------------------------------------------
# Fused decoder-block kernel (single program, no grid)
# ---------------------------------------------------------------------------
def _decoder_block_kernel(
    x_ref, enc_ref, tgt_mask_ref, src_mask_ref,
    # self-attention weights (Q|K|V fused)
    wqkv_s_ref, bqkv_s_ref, wo_s_ref, bo_s_ref,
    # cross-attention weights (K|V fused, applied to encoder output)
    wq_c_ref, bq_c_ref, wkv_c_ref, bkv_c_ref, wo_c_ref, bo_c_ref,
    # feed-forward weights
    w1_ref, b1_ref, w2_ref, b2_ref,
    # layer-norm scalars in SMEM: ln_ref[i] = (alpha_i, bias_i)
    ln_ref,
    o_ref,
):
    B, S, D = x_ref.shape
    Se = enc_ref.shape[1]
    h, dk = N_HEADS, D_K
    scale = 1.0 / math.sqrt(dk)

    x = x_ref[...].astype(jnp.float32).reshape(B * S, D)
    enc = enc_ref[...].astype(jnp.float32).reshape(B * Se, D)

    def layer_norm(v, idx):
        # Matches the PyTorch LayerNormalization: torch.std is unbiased
        # (/(n-1)) and eps is added to std (not to var); alpha/bias are scalars.
        n = v.shape[-1]
        mean = jnp.mean(v, axis=-1, keepdims=True)
        diff = v - mean
        var = jnp.sum(diff * diff, axis=-1, keepdims=True) / (n - 1)
        std = jnp.sqrt(var)
        return ln_ref[idx, 0] * diff / (std + LN_EPS) + ln_ref[idx, 1]

    def softmax(scores):
        m = jnp.max(scores, axis=-1, keepdims=True)
        e = jnp.exp(scores - m)
        denom = jnp.sum(e, axis=-1, keepdims=True)
        # approx reciprocal -> EUP slot (otherwise idle); error ~2^-12 relative.
        return e * pl.reciprocal(denom, approx=True)

    def mha(q2d, kv2d, mask4, Sq, Sk):
        """q2d: (B*Sq, D); kv2d: (B*Sk, 2D) = [K | V]; mask4: (B, h, Sq, Sk)."""
        q3 = q2d.reshape(B, Sq, D)
        k3 = kv2d[:, :D].reshape(B, Sk, D)
        v3 = kv2d[:, D:].reshape(B, Sk, D)
        ctx_heads = []
        for head in range(h):                         # static, unrolled
            sl = slice(head * dk, (head + 1) * dk)    # head = lane slice, no transpose
            qh, kh, vh = q3[:, :, sl], k3[:, :, sl], v3[:, :, sl]
            s = jnp.einsum("bqd,bkd->bqk", qh, kh,
                           preferred_element_type=jnp.float32) * scale
            s = jnp.where(mask4[:, head] == 0, -1e9, s)
            w = softmax(s)
            # TODO(synk): dropout on attention weights omitted (eval mode => identity).
            ctx_heads.append(jnp.einsum("bqk,bkd->bqd", w, vh,
                                        preferred_element_type=jnp.float32))
        ctx = jnp.concatenate(ctx_heads, axis=-1)     # (B, Sq, D)
        return ctx.reshape(B * Sq, D)

    # ---- residual connection 0: self-attention (pre-norm) -------------------
    nx = layer_norm(x, 0)
    qkv = jnp.dot(nx, wqkv_s_ref[...],
                  preferred_element_type=jnp.float32) + bqkv_s_ref[...]
    ctx = mha(qkv[:, :D], qkv[:, D:], tgt_mask_ref[...], S, S)
    x = x + jnp.dot(ctx, wo_s_ref[...],
                    preferred_element_type=jnp.float32) + bo_s_ref[...]

    # ---- residual connection 1: cross-attention (pre-norm on x only) --------
    nx = layer_norm(x, 1)
    q = jnp.dot(nx, wq_c_ref[...],
                preferred_element_type=jnp.float32) + bq_c_ref[...]
    kv = jnp.dot(enc, wkv_c_ref[...],
                 preferred_element_type=jnp.float32) + bkv_c_ref[...]
    ctx = mha(q, kv, src_mask_ref[...], S, Se)
    x = x + jnp.dot(ctx, wo_c_ref[...],
                    preferred_element_type=jnp.float32) + bo_c_ref[...]

    # ---- residual connection 2: feed-forward (pre-norm) ---------------------
    nx = layer_norm(x, 2)
    hidden = jnp.maximum(
        jnp.dot(nx, w1_ref[...], preferred_element_type=jnp.float32) + b1_ref[...],
        0.0)
    x = x + jnp.dot(hidden, w2_ref[...],
                    preferred_element_type=jnp.float32) + b2_ref[...]

    o_ref[...] = x.reshape(B, S, D).astype(o_ref.dtype)


# ---------------------------------------------------------------------------
# Wrapper
# ---------------------------------------------------------------------------
def decoder_block(x, encoder_output, src_mask, tgt_mask, params):
    B, S, D = x.shape
    Se = encoder_output.shape[1]
    sa, ca = params["self_attn"], params["cross_attn"]

    # Fuse projection weights so the kernel does one wide matmul per projection.
    wqkv_s = jnp.concatenate([sa["wq"], sa["wk"], sa["wv"]], axis=1)   # (D, 3D)
    bqkv_s = jnp.concatenate([sa["bq"], sa["bk"], sa["bv"]], axis=1)   # (1, 3D)
    wkv_c = jnp.concatenate([ca["wk"], ca["wv"]], axis=1)              # (D, 2D)
    bkv_c = jnp.concatenate([ca["bk"], ca["bv"]], axis=1)              # (1, 2D)

    # LayerNorm scalar params packed into one tiny SMEM table.
    ln = jnp.stack([
        jnp.concatenate([params["ln0_alpha"].reshape(1), params["ln0_bias"].reshape(1)]),
        jnp.concatenate([params["ln1_alpha"].reshape(1), params["ln1_bias"].reshape(1)]),
        jnp.concatenate([params["ln2_alpha"].reshape(1), params["ln2_bias"].reshape(1)]),
    ]).astype(jnp.float32)                                             # (3, 2)

    # Broadcast masks once (tiny: B*h*Sq*Sk floats); PyTorch semantics: 0 => masked.
    tgt_m = jnp.broadcast_to(tgt_mask, (B, N_HEADS, S, S)).astype(jnp.float32)
    src_m = jnp.broadcast_to(src_mask, (B, N_HEADS, S, Se)).astype(jnp.float32)

    # Single fused pallas_call: everything (weights ~50 KB + activations ~KB)
    # is VMEM-resident on all TPU generations; no grid needed at this size.
    # TODO(synk): if scaled up (large S/D/B), add a row-tiled grid with a
    # "parallel" leading axis (v7x megacore) and explicit vmem_limit_bytes.
    return pl.pallas_call(
        _decoder_block_kernel,
        out_shape=jax.ShapeDtypeStruct((B, S, D), x.dtype),
        in_specs=[VMEM_SPEC] * 18 + [SMEM_SPEC],
        out_specs=VMEM_SPEC,
    )(x, encoder_output, tgt_m, src_m,
      wqkv_s, bqkv_s, sa["wo"], sa["bo"],
      ca["wq"], ca["bq"], wkv_c, bkv_c, ca["wo"], ca["bo"],
      params["ffn_w1"], params["ffn_b1"], params["ffn_w2"], params["ffn_b2"],
      ln)


# ---------------------------------------------------------------------------
# Deterministic parameter init + demo
# ---------------------------------------------------------------------------
def _attn_params(key):
    ks = jax.random.split(key, 4)

    def lin(k):
        return (0.02 * jax.random.normal(k, (D_MODEL, D_MODEL), jnp.float32),
                jnp.zeros((1, D_MODEL), jnp.float32))

    wq, bq = lin(ks[0]); wk, bk = lin(ks[1]); wv, bv = lin(ks[2]); wo, bo = lin(ks[3])
    return dict(wq=wq, bq=bq, wk=wk, bk=bk, wv=wv, bv=bv, wo=wo, bo=bo)


def init_params(key):
    ks = jax.random.split(key, 4)
    params = dict(
        self_attn=_attn_params(ks[0]),
        cross_attn=_attn_params(ks[1]),
        ffn_w1=0.02 * jax.random.normal(ks[2], (D_MODEL, D_FF), jnp.float32),
        ffn_b1=jnp.zeros((1, D_FF), jnp.float32),
        ffn_w2=0.02 * jax.random.normal(ks[3], (D_FF, D_MODEL), jnp.float32),
        ffn_b2=jnp.zeros((1, D_MODEL), jnp.float32),
    )
    for i in range(3):
        params[f"ln{i}_alpha"] = jnp.ones((1, 1), jnp.float32)   # nn.Parameter(torch.ones(1))
        params[f"ln{i}_bias"] = jnp.zeros((1, 1), jnp.float32)   # nn.Parameter(torch.zeros(1))
    return params


if __name__ == "__main__":
    B, S_TGT, S_SRC = 2, 8, 8
    key = jax.random.PRNGKey(0)
    kx, kenc, kp = jax.random.split(key, 3)

    x = jax.random.normal(kx, (B, S_TGT, D_MODEL), jnp.float32)
    encoder_output = jax.random.normal(kenc, (B, S_SRC, D_MODEL), jnp.float32)
    # causal target mask, all-ones source mask (mask==0 positions are masked)
    tgt_mask = jnp.tril(jnp.ones((S_TGT, S_TGT), jnp.float32))[None, None]
    src_mask = jnp.ones((1, 1, S_TGT, S_SRC), jnp.float32)

    params = init_params(kp)

    decoder_fn = jax.jit(decoder_block)
    out = decoder_fn(x, encoder_output, src_mask, tgt_mask, params)
    out = jax.block_until_ready(out)
    assert out.shape == (B, S_TGT, D_MODEL)
    assert bool(jnp.all(jnp.isfinite(out)))
    print("KERNEL_OK")
</pallas_src>

<mosaic_0001>
module attributes {stable_mosaic.version = 11 : i64} {
  func.func @_decoder_block_kernel(%arg0: memref<2x8x32xf32, #tpu.memory_space<vmem>>, %arg1: memref<2x8x32xf32, #tpu.memory_space<vmem>>, %arg2: memref<2x4x8x8xf32, #tpu.memory_space<vmem>>, %arg3: memref<2x4x8x8xf32, #tpu.memory_space<vmem>>, %arg4: memref<32x96xf32, #tpu.memory_space<vmem>>, %arg5: memref<1x96xf32, #tpu.memory_space<vmem>>, %arg6: memref<32x32xf32, #tpu.memory_space<vmem>>, %arg7: memref<1x32xf32, #tpu.memory_space<vmem>>, %arg8: memref<32x32xf32, #tpu.memory_space<vmem>>, %arg9: memref<1x32xf32, #tpu.memory_space<vmem>>, %arg10: memref<32x64xf32, #tpu.memory_space<vmem>>, %arg11: memref<1x64xf32, #tpu.memory_space<vmem>>, %arg12: memref<32x32xf32, #tpu.memory_space<vmem>>, %arg13: memref<1x32xf32, #tpu.memory_space<vmem>>, %arg14: memref<32x64xf32, #tpu.memory_space<vmem>>, %arg15: memref<1x64xf32, #tpu.memory_space<vmem>>, %arg16: memref<64x32xf32, #tpu.memory_space<vmem>>, %arg17: memref<1x32xf32, #tpu.memory_space<vmem>>, %arg18: memref<3x2xf32, #tpu.memory_space<smem>>, %arg19: memref<2x8x32xf32, #tpu.memory_space<vmem>>) attributes {dimension_semantics = [], scalar_prefetch = 0 : i64, scratch_operands = 0 : i64, tpu.core_type = #tpu.core_type<tc>} {
    %c0 = arith.constant 0 : index
    %c0_0 = arith.constant 0 : index
    %c0_1 = arith.constant 0 : index
    %0 = vector.load %arg0[%c0, %c0_0, %c0_1] : memref<2x8x32xf32, #tpu.memory_space<vmem>>, vector<2x8x32xf32>
    %1 = vector.shape_cast %0 : vector<2x8x32xf32> to vector<16x32xf32>
    %c0_2 = arith.constant 0 : index
    %c0_3 = arith.constant 0 : index
    %c0_4 = arith.constant 0 : index
    %2 = vector.load %arg1[%c0_2, %c0_3, %c0_4] : memref<2x8x32xf32, #tpu.memory_space<vmem>>, vector<2x8x32xf32>
    %3 = vector.shape_cast %2 : vector<2x8x32xf32> to vector<16x32xf32>
    %cst = arith.constant dense<0.000000e+00> : vector<16xf32>
    %4 = vector.multi_reduction <add>, %1, %cst [1] : vector<16x32xf32> to vector<16xf32>
    %5 = vector.shape_cast %4 : vector<16xf32> to vector<16x1xf32>
    %cst_5 = arith.constant 3.200000e+01 : f32
    %6 = vector.broadcast %cst_5 : f32 to vector<16x1xf32>
    %7 = arith.divf %5, %6 : vector<16x1xf32>
    %8 = vector.broadcast %7 : vector<16x1xf32> to vector<16x32xf32>
    %9 = arith.subf %1, %8 : vector<16x32xf32>
    %10 = arith.mulf %9, %9 : vector<16x32xf32>
    %cst_6 = arith.constant dense<0.000000e+00> : vector<16xf32>
    %11 = vector.multi_reduction <add>, %10, %cst_6 [1] : vector<16x32xf32> to vector<16xf32>
    %12 = vector.shape_cast %11 : vector<16xf32> to vector<16x1xf32>
    %cst_7 = arith.constant 3.100000e+01 : f32
    %13 = vector.broadcast %cst_7 : f32 to vector<16x1xf32>
    %14 = arith.divf %12, %13 : vector<16x1xf32>
    %15 = math.sqrt %14 : vector<16x1xf32>
    %c0_8 = arith.constant 0 : index
    %c0_9 = arith.constant 0 : index
    %16 = memref.load %arg18[%c0_8, %c0_9] : memref<3x2xf32, #tpu.memory_space<smem>>
    %17 = vector.broadcast %16 : f32 to vector<16x32xf32>
    %18 = arith.mulf %17, %9 : vector<16x32xf32>
    %cst_10 = arith.constant 9.99999997E-7 : f32
    %19 = vector.broadcast %cst_10 : f32 to vector<16x1xf32>
    %20 = arith.addf %15, %19 : vector<16x1xf32>
    %21 = vector.broadcast %20 : vector<16x1xf32> to vector<16x32xf32>
    %22 = arith.divf %18, %21 : vector<16x32xf32>
    %c0_11 = arith.constant 0 : index
    %c1 = arith.constant 1 : index
    %23 = memref.load %arg18[%c0_11, %c1] : memref<3x2xf32, #tpu.memory_space<smem>>
    %24 = vector.broadcast %23 : f32 to vector<16x32xf32>
    %25 = arith.addf %22, %24 : vector<16x32xf32>
    %c0_12 = arith.constant 0 : index
    %c0_13 = arith.constant 0 : index
    %26 = vector.load %arg4[%c0_12, %c0_13] : memref<32x96xf32, #tpu.memory_space<vmem>>, vector<32x96xf32>
    %cst_14 = arith.constant dense<0.000000e+00> : vector<16x96xf32>
    %27 = tpu.matmul %25, %26, %cst_14 {dimension_numbers = #tpu.dot_dimension_numbers<[1], [0], [0], [1], [0, 0, 1, 1], [], []>} : vector<16x32xf32>, vector<32x96xf32>, vector<16x96xf32> -> vector<16x96xf32>
    %c0_15 = arith.constant 0 : index
    %c0_16 = arith.constant 0 : index
    %28 = vector.load %arg5[%c0_15, %c0_16] : memref<1x96xf32, #tpu.memory_space<vmem>>, vector<1x96xf32>
    %29 = vector.broadcast %28 : vector<1x96xf32> to vector<16x96xf32>
    %30 = arith.addf %27, %29 : vector<16x96xf32>
    %31 = vector.extract_strided_slice %30 {offsets = [0, 0], sizes = [16, 32], strides = [1, 1]} : vector<16x96xf32> to vector<16x32xf32>
    %32 = vector.extract_strided_slice %30 {offsets = [0, 32], sizes = [16, 64], strides = [1, 1]} : vector<16x96xf32> to vector<16x64xf32>
    %c0_17 = arith.constant 0 : index
    %c0_18 = arith.constant 0 : index
    %c0_19 = arith.constant 0 : index
    %c0_20 = arith.constant 0 : index
    %33 = vector.load %arg2[%c0_17, %c0_18, %c0_19, %c0_20] : memref<2x4x8x8xf32, #tpu.memory_space<vmem>>, vector<2x4x8x8xf32>
    %34 = vector.shape_cast %31 : vector<16x32xf32> to vector<2x8x32xf32>
    %35 = vector.extract_strided_slice %32 {offsets = [0, 0], sizes = [16, 32], strides = [1, 1]} : vector<16x64xf32> to vector<16x32xf32>
    %36 = vector.shape_cast %35 : vector<16x32xf32> to vector<2x8x32xf32>
    %37 = vector.extract_strided_slice %32 {offsets = [0, 32], sizes = [16, 32], strides = [1, 1]} : vector<16x64xf32> to vector<16x32xf32>
    %38 = vector.shape_cast %37 : vector<16x32xf32> to vector<2x8x32xf32>
    %39 = vector.extract_strided_slice %34 {offsets = [0, 0, 0], sizes = [2, 8, 8], strides = [1, 1, 1]} : vector<2x8x32xf32> to vector<2x8x8xf32>
    %40 = vector.extract_strided_slice %36 {offsets = [0, 0, 0], sizes = [2, 8, 8], strides = [1, 1, 1]} : vector<2x8x32xf32> to vector<2x8x8xf32>
    %41 = vector.extract_strided_slice %38 {offsets = [0, 0, 0], sizes = [2, 8, 8], strides = [1, 1, 1]} : vector<2x8x32xf32> to vector<2x8x8xf32>
    "tpu.trace_start"() <{level = 10 : i32, message = "bqd,bkd->bqk"}> : () -> ()
    %cst_21 = arith.constant dense<0.000000e+00> : vector<2x8x8xf32>
    %42 = tpu.matmul %39, %40, %cst_21 {dimension_numbers = #tpu.dot_dimension_numbers<[2], [2], [1], [1], [0, 0, 0, 1, 1, 1], [0], [0]>} : vector<2x8x8xf32>, vector<2x8x8xf32>, vector<2x8x8xf32> -> vector<2x8x8xf32>
    "tpu.trace_stop"() : () -> ()
    %cst_22 = arith.constant 0.353553385 : f32
    %43 = vector.broadcast %cst_22 : f32 to vector<2x8x8xf32>
    %44 = arith.mulf %42, %43 : vector<2x8x8xf32>
    %45 = vector.extract_strided_slice %33 {offsets = [0, 0, 0, 0], sizes = [2, 1, 8, 8], strides = [1, 1, 1, 1]} : vector<2x4x8x8xf32> to vector<2x1x8x8xf32>
    %46 = vector.shape_cast %45 : vector<2x1x8x8xf32> to vector<2x8x8xf32>
    %cst_23 = arith.constant 0.000000e+00 : f32
    %47 = vector.broadcast %cst_23 : f32 to vector<2x8x8xf32>
    %48 = arith.cmpf oeq, %46, %47 : vector<2x8x8xf32>
    %cst_24 = arith.constant -1.000000e+09 : f32
    %49 = vector.broadcast %cst_24 : f32 to vector<2x8x8xf32>
    %50 = arith.select %48, %49, %44 : vector<2x8x8xi1>, vector<2x8x8xf32>
    %cst_25 = arith.constant dense<0xFF800000> : vector<2x8xf32>
    %51 = vector.multi_reduction <maximumf>, %50, %cst_25 [2] : vector<2x8x8xf32> to vector<2x8xf32>
    %52 = vector.shape_cast %51 : vector<2x8xf32> to vector<2x8x1xf32>
    %53 = vector.broadcast %52 : vector<2x8x1xf32> to vector<2x8x8xf32>
    %54 = arith.subf %50, %53 : vector<2x8x8xf32>
    %55 = math.exp %54 : vector<2x8x8xf32>
    %cst_26 = arith.constant dense<0.000000e+00> : vector<2x8xf32>
    %56 = vector.multi_reduction <add>, %55, %cst_26 [2] : vector<2x8x8xf32> to vector<2x8xf32>
    %57 = vector.shape_cast %56 : vector<2x8xf32> to vector<2x8x1xf32>
    %58 = tpu.reciprocal %57 {approx = true} : vector<2x8x1xf32> -> vector<2x8x1xf32>
    %59 = vector.broadcast %58 : vector<2x8x1xf32> to vector<2x8x8xf32>
    %60 = arith.mulf %55, %59 : vector<2x8x8xf32>
    "tpu.trace_start"() <{level = 10 : i32, message = "bqk,bkd->bqd"}> : () -> ()
    %cst_27 = arith.constant dense<0.000000e+00> : vector<2x8x8xf32>
    %61 = tpu.matmul %60, %41, %cst_27 {dimension_numbers = #tpu.dot_dimension_numbers<[2], [1], [1], [2], [0, 0, 0, 1, 1, 2], [0], [0]>} : vector<2x8x8xf32>, vector<2x8x8xf32>, vector<2x8x8xf32> -> vector<2x8x8xf32>
    "tpu.trace_stop"() : () -> ()
    %62 = vector.extract_strided_slice %34 {offsets = [0, 0, 8], sizes = [2, 8, 8], strides = [1, 1, 1]} : vector<2x8x32xf32> to vector<2x8x8xf32>
    %63 = vector.extract_strided_slice %36 {offsets = [0, 0, 8], sizes = [2, 8, 8], strides = [1, 1, 1]} : vector<2x8x32xf32> to vector<2x8x8xf32>
    %64 = vector.extract_strided_slice %38 {offsets = [0, 0, 8], sizes = [2, 8, 8], strides = [1, 1, 1]} : vector<2x8x32xf32> to vector<2x8x8xf32>
    "tpu.trace_start"() <{level = 10 : i32, message = "bqd,bkd->bqk"}> : () -> ()
    %cst_28 = arith.constant dense<0.000000e+00> : vector<2x8x8xf32>
    %65 = tpu.matmul %62, %63, %cst_28 {dimension_numbers = #tpu.dot_dimension_numbers<[2], [2], [1], [1], [0, 0, 0, 1, 1, 1], [0], [0]>} : vector<2x8x8xf32>, vector<2x8x8xf32>, vector<2x8x8xf32> -> vector<2x8x8xf32>
    "tpu.trace_stop"() : () -> ()
    %cst_29 = arith.constant 0.353553385 : f32
    %66 = vector.broadcast %cst_29 : f32 to vector<2x8x8xf32>
    %67 = arith.mulf %65, %66 : vector<2x8x8xf32>
    %68 = vector.extract_strided_slice %33 {offsets = [0, 1, 0, 0], sizes = [2, 1, 8, 8], strides = [1, 1, 1, 1]} : vector<2x4x8x8xf32> to vector<2x1x8x8xf32>
    %69 = vector.shape_cast %68 : vector<2x1x8x8xf32> to vector<2x8x8xf32>
    %cst_30 = arith.constant 0.000000e+00 : f32
    %70 = vector.broadcast %cst_30 : f32 to vector<2x8x8xf32>
    %71 = arith.cmpf oeq, %69, %70 : vector<2x8x8xf32>
    %cst_31 = arith.constant -1.000000e+09 : f32
    %72 = vector.broadcast %cst_31 : f32 to vector<2x8x8xf32>
    %73 = arith.select %71, %72, %67 : vector<2x8x8xi1>, vector<2x8x8xf32>
    %cst_32 = arith.constant dense<0xFF800000> : vector<2x8xf32>
    %74 = vector.multi_reduction <maximumf>, %73, %cst_32 [2] : vector<2x8x8xf32> to vector<2x8xf32>
    %75 = vector.shape_cast %74 : vector<2x8xf32> to vector<2x8x1xf32>
    %76 = vector.broadcast %75 : vector<2x8x1xf32> to vector<2x8x8xf32>
    %77 = arith.subf %73, %76 : vector<2x8x8xf32>
    %78 = math.exp %77 : vector<2x8x8xf32>
    %cst_33 = arith.constant dense<0.000000e+00> : vector<2x8xf32>
    %79 = vector.multi_reduction <add>, %78, %cst_33 [2] : vector<2x8x8xf32> to vector<2x8xf32>
    %80 = vector.shape_cast %79 : vector<2x8xf32> to vector<2x8x1xf32>
    %81 = tpu.reciprocal %80 {approx = true} : vector<2x8x1xf32> -> vector<2x8x1xf32>
    %82 = vector.broadcast %81 : vector<2x8x1xf32> to vector<2x8x8xf32>
    %83 = arith.mulf %78, %82 : vector<2x8x8xf32>
    "tpu.trace_start"() <{level = 10 : i32, message = "bqk,bkd->bqd"}> : () -> ()
    %cst_34 = arith.constant dense<0.000000e+00> : vector<2x8x8xf32>
    %84 = tpu.matmul %83, %64, %cst_34 {dimension_numbers = #tpu.dot_dimension_numbers<[2], [1], [1], [2], [0, 0, 0, 1, 1, 2], [0], [0]>} : vector<2x8x8xf32>, vector<2x8x8xf32>, vector<2x8x8xf32> -> vector<2x8x8xf32>
    "tpu.trace_stop"() : () -> ()
    %85 = vector.extract_strided_slice %34 {offsets = [0, 0, 16], sizes = [2, 8, 8], strides = [1, 1, 1]} : vector<2x8x32xf32> to vector<2x8x8xf32>
    %86 = vector.extract_strided_slice %36 {offsets = [0, 0, 16], sizes = [2, 8, 8], strides = [1, 1, 1]} : vector<2x8x32xf32> to vector<2x8x8xf32>
    %87 = vector.extract_strided_slice %38 {offsets = [0, 0, 16], sizes = [2, 8, 8], strides = [1, 1, 1]} : vector<2x8x32xf32> to vector<2x8x8xf32>
    "tpu.trace_start"() <{level = 10 : i32, message = "bqd,bkd->bqk"}> : () -> ()
    %cst_35 = arith.constant dense<0.000000e+00> : vector<2x8x8xf32>
    %88 = tpu.matmul %85, %86, %cst_35 {dimension_numbers = #tpu.dot_dimension_numbers<[2], [2], [1], [1], [0, 0, 0, 1, 1, 1], [0], [0]>} : vector<2x8x8xf32>, vector<2x8x8xf32>, vector<2x8x8xf32> -> vector<2x8x8xf32>
    "tpu.trace_stop"() : () -> ()
    %cst_36 = arith.constant 0.353553385 : f32
    %89 = vector.broadcast %cst_36 : f32 to vector<2x8x8xf32>
    %90 = arith.mulf %88, %89 : vector<2x8x8xf32>
    %91 = vector.extract_strided_slice %33 {offsets = [0, 2, 0, 0], sizes = [2, 1, 8, 8], strides = [1, 1, 1, 1]} : vector<2x4x8x8xf32> to vector<2x1x8x8xf32>
    %92 = vector.shape_cast %91 : vector<2x1x8x8xf32> to vector<2x8x8xf32>
    %cst_37 = arith.constant 0.000000e+00 : f32
    %93 = vector.broadcast %cst_37 : f32 to vector<2x8x8xf32>
    %94 = arith.cmpf oeq, %92, %93 : vector<2x8x8xf32>
    %cst_38 = arith.constant -1.000000e+09 : f32
    %95 = vector.broadcast %cst_38 : f32 to vector<2x8x8xf32>
    %96 = arith.select %94, %95, %90 : vector<2x8x8xi1>, vector<2x8x8xf32>
    %cst_39 = arith.constant dense<0xFF800000> : vector<2x8xf32>
    %97 = vector.multi_reduction <maximumf>, %96, %cst_39 [2] : vector<2x8x8xf32> to vector<2x8xf32>
    %98 = vector.shape_cast %97 : vector<2x8xf32> to vector<2x8x1xf32>
    %99 = vector.broadcast %98 : vector<2x8x1xf32> to vector<2x8x8xf32>
    %100 = arith.subf %96, %99 : vector<2x8x8xf32>
    %101 = math.exp %100 : vector<2x8x8xf32>
    %cst_40 = arith.constant dense<0.000000e+00> : vector<2x8xf32>
    %102 = vector.multi_reduction <add>, %101, %cst_40 [2] : vector<2x8x8xf32> to vector<2x8xf32>
    %103 = vector.shape_cast %102 : vector<2x8xf32> to vector<2x8x1xf32>
    %104 = tpu.reciprocal %103 {approx = true} : vector<2x8x1xf32> -> vector<2x8x1xf32>
    %105 = vector.broadcast %104 : vector<2x8x1xf32> to vector<2x8x8xf32>
    %106 = arith.mulf %101, %105 : vector<2x8x8xf32>
    "tpu.trace_start"() <{level = 10 : i32, message = "bqk,bkd->bqd"}> : () -> ()
    %cst_41 = arith.constant dense<0.000000e+00> : vector<2x8x8xf32>
    %107 = tpu.matmul %106, %87, %cst_41 {dimension_numbers = #tpu.dot_dimension_numbers<[2], [1], [1], [2], [0, 0, 0, 1, 1, 2], [0], [0]>} : vector<2x8x8xf32>, vector<2x8x8xf32>, vector<2x8x8xf32> -> vector<2x8x8xf32>
    "tpu.trace_stop"() : () -> ()
    %108 = vector.extract_strided_slice %34 {offsets = [0, 0, 24], sizes = [2, 8, 8], strides = [1, 1, 1]} : vector<2x8x32xf32> to vector<2x8x8xf32>
    %109 = vector.extract_strided_slice %36 {offsets = [0, 0, 24], sizes = [2, 8, 8], strides = [1, 1, 1]} : vector<2x8x32xf32> to vector<2x8x8xf32>
    %110 = vector.extract_strided_slice %38 {offsets = [0, 0, 24], sizes = [2, 8, 8], strides = [1, 1, 1]} : vector<2x8x32xf32> to vector<2x8x8xf32>
    "tpu.trace_start"() <{level = 10 : i32, message = "bqd,bkd->bqk"}> : () -> ()
    %cst_42 = arith.constant dense<0.000000e+00> : vector<2x8x8xf32>
    %111 = tpu.matmul %108, %109, %cst_42 {dimension_numbers = #tpu.dot_dimension_numbers<[2], [2], [1], [1], [0, 0, 0, 1, 1, 1], [0], [0]>} : vector<2x8x8xf32>, vector<2x8x8xf32>, vector<2x8x8xf32> -> vector<2x8x8xf32>
    "tpu.trace_stop"() : () -> ()
    %cst_43 = arith.constant 0.353553385 : f32
    %112 = vector.broadcast %cst_43 : f32 to vector<2x8x8xf32>
    %113 = arith.mulf %111, %112 : vector<2x8x8xf32>
    %114 = vector.extract_strided_slice %33 {offsets = [0, 3, 0, 0], sizes = [2, 1, 8, 8], strides = [1, 1, 1, 1]} : vector<2x4x8x8xf32> to vector<2x1x8x8xf32>
    %115 = vector.shape_cast %114 : vector<2x1x8x8xf32> to vector<2x8x8xf32>
    %cst_44 = arith.constant 0.000000e+00 : f32
    %116 = vector.broadcast %cst_44 : f32 to vector<2x8x8xf32>
    %117 = arith.cmpf oeq, %115, %116 : vector<2x8x8xf32>
    %cst_45 = arith.constant -1.000000e+09 : f32
    %118 = vector.broadcast %cst_45 : f32 to vector<2x8x8xf32>
    %119 = arith.select %117, %118, %113 : vector<2x8x8xi1>, vector<2x8x8xf32>
    %cst_46 = arith.constant dense<0xFF800000> : vector<2x8xf32>
    %120 = vector.multi_reduction <maximumf>, %119, %cst_46 [2] : vector<2x8x8xf32> to vector<2x8xf32>
    %121 = vector.shape_cast %120 : vector<2x8xf32> to vector<2x8x1xf32>
    %122 = vector.broadcast %121 : vector<2x8x1xf32> to vector<2x8x8xf32>
    %123 = arith.subf %119, %122 : vector<2x8x8xf32>
    %124 = math.exp %123 : vector<2x8x8xf32>
    %cst_47 = arith.constant dense<0.000000e+00> : vector<2x8xf32>
    %125 = vector.multi_reduction <add>, %124, %cst_47 [2] : vector<2x8x8xf32> to vector<2x8xf32>
    %126 = vector.shape_cast %125 : vector<2x8xf32> to vector<2x8x1xf32>
    %127 = tpu.reciprocal %126 {approx = true} : vector<2x8x1xf32> -> vector<2x8x1xf32>
    %128 = vector.broadcast %127 : vector<2x8x1xf32> to vector<2x8x8xf32>
    %129 = arith.mulf %124, %128 : vector<2x8x8xf32>
    "tpu.trace_start"() <{level = 10 : i32, message = "bqk,bkd->bqd"}> : () -> ()
    %cst_48 = arith.constant dense<0.000000e+00> : vector<2x8x8xf32>
    %130 = tpu.matmul %129, %110, %cst_48 {dimension_numbers = #tpu.dot_dimension_numbers<[2], [1], [1], [2], [0, 0, 0, 1, 1, 2], [0], [0]>} : vector<2x8x8xf32>, vector<2x8x8xf32>, vector<2x8x8xf32> -> vector<2x8x8xf32>
    "tpu.trace_stop"() : () -> ()
    %131 = tpu.concatenate %61, %84, %107, %130 in 2 : vector<2x8x8xf32>, vector<2x8x8xf32>, vector<2x8x8xf32>, vector<2x8x8xf32> -> vector<2x8x32xf32>
    %132 = vector.shape_cast %131 : vector<2x8x32xf32> to vector<16x32xf32>
    %c0_49 = arith.constant 0 : index
    %c0_50 = arith.constant 0 : index
    %133 = vector.load %arg6[%c0_49, %c0_50] : memref<32x32xf32, #tpu.memory_space<vmem>>, vector<32x32xf32>
    %cst_51 = arith.constant dense<0.000000e+00> : vector<16x32xf32>
    %134 = tpu.matmul %132, %133, %cst_51 {dimension_numbers = #tpu.dot_dimension_numbers<[1], [0], [0], [1], [0, 0, 1, 1], [], []>} : vector<16x32xf32>, vector<32x32xf32>, vector<16x32xf32> -> vector<16x32xf32>
    %135 = arith.addf %1, %134 : vector<16x32xf32>
    %c0_52 = arith.constant 0 : index
    %c0_53 = arith.constant 0 : index
    %136 = vector.load %arg7[%c0_52, %c0_53] : memref<1x32xf32, #tpu.memory_space<vmem>>, vector<1x32xf32>
    %137 = vector.broadcast %136 : vector<1x32xf32> to vector<16x32xf32>
    %138 = arith.addf %135, %137 : vector<16x32xf32>
    %cst_54 = arith.constant dense<0.000000e+00> : vector<16xf32>
    %139 = vector.multi_reduction <add>, %138, %cst_54 [1] : vector<16x32xf32> to vector<16xf32>
    %140 = vector.shape_cast %139 : vector<16xf32> to vector<16x1xf32>
    %cst_55 = arith.constant 3.200000e+01 : f32
    %141 = vector.broadcast %cst_55 : f32 to vector<16x1xf32>
    %142 = arith.divf %140, %141 : vector<16x1xf32>
    %143 = vector.broadcast %142 : vector<16x1xf32> to vector<16x32xf32>
    %144 = arith.subf %138, %143 : vector<16x32xf32>
    %145 = arith.mulf %144, %144 : vector<16x32xf32>
    %cst_56 = arith.constant dense<0.000000e+00> : vector<16xf32>
    %146 = vector.multi_reduction <add>, %145, %cst_56 [1] : vector<16x32xf32> to vector<16xf32>
    %147 = vector.shape_cast %146 : vector<16xf32> to vector<16x1xf32>
    %cst_57 = arith.constant 3.100000e+01 : f32
    %148 = vector.broadcast %cst_57 : f32 to vector<16x1xf32>
    %149 = arith.divf %147, %148 : vector<16x1xf32>
    %150 = math.sqrt %149 : vector<16x1xf32>
    %c1_58 = arith.constant 1 : index
    %c0_59 = arith.constant 0 : index
    %151 = memref.load %arg18[%c1_58, %c0_59] : memref<3x2xf32, #tpu.memory_space<smem>>
    %152 = vector.broadcast %151 : f32 to vector<16x32xf32>
    %153 = arith.mulf %152, %144 : vector<16x32xf32>
    %cst_60 = arith.constant 9.99999997E-7 : f32
    %154 = vector.broadcast %cst_60 : f32 to vector<16x1xf32>
    %155 = arith.addf %150, %154 : vector<16x1xf32>
    %156 = vector.broadcast %155 : vector<16x1xf32> to vector<16x32xf32>
    %157 = arith.divf %153, %156 : vector<16x32xf32>
    %c1_61 = arith.constant 1 : index
    %c1_62 = arith.constant 1 : index
    %158 = memref.load %arg18[%c1_61, %c1_62] : memref<3x2xf32, #tpu.memory_space<smem>>
    %159 = vector.broadcast %158 : f32 to vector<16x32xf32>
    %160 = arith.addf %157, %159 : vector<16x32xf32>
    %c0_63 = arith.constant 0 : index
    %c0_64 = arith.constant 0 : index
    %161 = vector.load %arg8[%c0_63, %c0_64] : memref<32x32xf32, #tpu.memory_space<vmem>>, vector<32x32xf32>
    %cst_65 = arith.constant dense<0.000000e+00> : vector<16x32xf32>
    %162 = tpu.matmul %160, %161, %cst_65 {dimension_numbers = #tpu.dot_dimension_numbers<[1], [0], [0], [1], [0, 0, 1, 1], [], []>} : vector<16x32xf32>, vector<32x32xf32>, vector<16x32xf32> -> vector<16x32xf32>
    %c0_66 = arith.constant 0 : index
    %c0_67 = arith.constant 0 : index
    %163 = vector.load %arg9[%c0_66, %c0_67] : memref<1x32xf32, #tpu.memory_space<vmem>>, vector<1x32xf32>
    %164 = vector.broadcast %163 : vector<1x32xf32> to vector<16x32xf32>
    %165 = arith.addf %162, %164 : vector<16x32xf32>
    %c0_68 = arith.constant 0 : index
    %c0_69 = arith.constant 0 : index
    %166 = vector.load %arg10[%c0_68, %c0_69] : memref<32x64xf32, #tpu.memory_space<vmem>>, vector<32x64xf32>
    %cst_70 = arith.constant dense<0.000000e+00> : vector<16x64xf32>
    %167 = tpu.matmul %3, %166, %cst_70 {dimension_numbers = #tpu.dot_dimension_numbers<[1], [0], [0], [1], [0, 0, 1, 1], [], []>} : vector<16x32xf32>, vector<32x64xf32>, vector<16x64xf32> -> vector<16x64xf32>
    %c0_71 = arith.constant 0 : index
    %c0_72 = arith.constant 0 : index
    %168 = vector.load %arg11[%c0_71, %c0_72] : memref<1x64xf32, #tpu.memory_space<vmem>>, vector<1x64xf32>
    %169 = vector.broadcast %168 : vector<1x64xf32> to vector<16x64xf32>
    %170 = arith.addf %167, %169 : vector<16x64xf32>
    %c0_73 = arith.constant 0 : index
    %c0_74 = arith.constant 0 : index
    %c0_75 = arith.constant 0 : index
    %c0_76 = arith.constant 0 : index
    %171 = vector.load %arg3[%c0_73, %c0_74, %c0_75, %c0_76] : memref<2x4x8x8xf32, #tpu.memory_space<vmem>>, vector<2x4x8x8xf32>
    %172 = vector.shape_cast %165 : vector<16x32xf32> to vector<2x8x32xf32>
    %173 = vector.extract_strided_slice %170 {offsets = [0, 0], sizes = [16, 32], strides = [1, 1]} : vector<16x64xf32> to vector<16x32xf32>
    %174 = vector.shape_cast %173 : vector<16x32xf32> to vector<2x8x32xf32>
    %175 = vector.extract_strided_slice %170 {offsets = [0, 32], sizes = [16, 32], strides = [1, 1]} : vector<16x64xf32> to vector<16x32xf32>
    %176 = vector.shape_cast %175 : vector<16x32xf32> to vector<2x8x32xf32>
    %177 = vector.extract_strided_slice %172 {offsets = [0, 0, 0], sizes = [2, 8, 8], strides = [1, 1, 1]} : vector<2x8x32xf32> to vector<2x8x8xf32>
    %178 = vector.extract_strided_slice %174 {offsets = [0, 0, 0], sizes = [2, 8, 8], strides = [1, 1, 1]} : vector<2x8x32xf32> to vector<2x8x8xf32>
    %179 = vector.extract_strided_slice %176 {offsets = [0, 0, 0], sizes = [2, 8, 8], strides = [1, 1, 1]} : vector<2x8x32xf32> to vector<2x8x8xf32>
    "tpu.trace_start"() <{level = 10 : i32, message = "bqd,bkd->bqk"}> : () -> ()
    %cst_77 = arith.constant dense<0.000000e+00> : vector<2x8x8xf32>
    %180 = tpu.matmul %177, %178, %cst_77 {dimension_numbers = #tpu.dot_dimension_numbers<[2], [2], [1], [1], [0, 0, 0, 1, 1, 1], [0], [0]>} : vector<2x8x8xf32>, vector<2x8x8xf32>, vector<2x8x8xf32> -> vector<2x8x8xf32>
    "tpu.trace_stop"() : () -> ()
    %cst_78 = arith.constant 0.353553385 : f32
    %181 = vector.broadcast %cst_78 : f32 to vector<2x8x8xf32>
    %182 = arith.mulf %180, %181 : vector<2x8x8xf32>
    %183 = vector.extract_strided_slice %171 {offsets = [0, 0, 0, 0], sizes = [2, 1, 8, 8], strides = [1, 1, 1, 1]} : vector<2x4x8x8xf32> to vector<2x1x8x8xf32>
    %184 = vector.shape_cast %183 : vector<2x1x8x8xf32> to vector<2x8x8xf32>
    %cst_79 = arith.constant 0.000000e+00 : f32
    %185 = vector.broadcast %cst_79 : f32 to vector<2x8x8xf32>
    %186 = arith.cmpf oeq, %184, %185 : vector<2x8x8xf32>
    %cst_80 = arith.constant -1.000000e+09 : f32
    %187 = vector.broadcast %cst_80 : f32 to vector<2x8x8xf32>
    %188 = arith.select %186, %187, %182 : vector<2x8x8xi1>, vector<2x8x8xf32>
    %cst_81 = arith.constant dense<0xFF800000> : vector<2x8xf32>
    %189 = vector.multi_reduction <maximumf>, %188, %cst_81 [2] : vector<2x8x8xf32> to vector<2x8xf32>
    %190 = vector.shape_cast %189 : vector<2x8xf32> to vector<2x8x1xf32>
    %191 = vector.broadcast %190 : vector<2x8x1xf32> to vector<2x8x8xf32>
    %192 = arith.subf %188, %191 : vector<2x8x8xf32>
    %193 = math.exp %192 : vector<2x8x8xf32>
    %cst_82 = arith.constant dense<0.000000e+00> : vector<2x8xf32>
    %194 = vector.multi_reduction <add>, %193, %cst_82 [2] : vector<2x8x8xf32> to vector<2x8xf32>
    %195 = vector.shape_cast %194 : vector<2x8xf32> to vector<2x8x1xf32>
    %196 = tpu.reciprocal %195 {approx = true} : vector<2x8x1xf32> -> vector<2x8x1xf32>
    %197 = vector.broadcast %196 : vector<2x8x1xf32> to vector<2x8x8xf32>
    %198 = arith.mulf %193, %197 : vector<2x8x8xf32>
    "tpu.trace_start"() <{level = 10 : i32, message = "bqk,bkd->bqd"}> : () -> ()
    %cst_83 = arith.constant dense<0.000000e+00> : vector<2x8x8xf32>
    %199 = tpu.matmul %198, %179, %cst_83 {dimension_numbers = #tpu.dot_dimension_numbers<[2], [1], [1], [2], [0, 0, 0, 1, 1, 2], [0], [0]>} : vector<2x8x8xf32>, vector<2x8x8xf32>, vector<2x8x8xf32> -> vector<2x8x8xf32>
    "tpu.trace_stop"() : () -> ()
    %200 = vector.extract_strided_slice %172 {offsets = [0, 0, 8], sizes = [2, 8, 8], strides = [1, 1, 1]} : vector<2x8x32xf32> to vector<2x8x8xf32>
    %201 = vector.extract_strided_slice %174 {offsets = [0, 0, 8], sizes = [2, 8, 8], strides = [1, 1, 1]} : vector<2x8x32xf32> to vector<2x8x8xf32>
    %202 = vector.extract_strided_slice %176 {offsets = [0, 0, 8], sizes = [2, 8, 8], strides = [1, 1, 1]} : vector<2x8x32xf32> to vector<2x8x8xf32>
    "tpu.trace_start"() <{level = 10 : i32, message = "bqd,bkd->bqk"}> : () -> ()
    %cst_84 = arith.constant dense<0.000000e+00> : vector<2x8x8xf32>
    %203 = tpu.matmul %200, %201, %cst_84 {dimension_numbers = #tpu.dot_dimension_numbers<[2], [2], [1], [1], [0, 0, 0, 1, 1, 1], [0], [0]>} : vector<2x8x8xf32>, vector<2x8x8xf32>, vector<2x8x8xf32> -> vector<2x8x8xf32>
    "tpu.trace_stop"() : () -> ()
    %cst_85 = arith.constant 0.353553385 : f32
    %204 = vector.broadcast %cst_85 : f32 to vector<2x8x8xf32>
    %205 = arith.mulf %203, %204 : vector<2x8x8xf32>
    %206 = vector.extract_strided_slice %171 {offsets = [0, 1, 0, 0], sizes = [2, 1, 8, 8], strides = [1, 1, 1, 1]} : vector<2x4x8x8xf32> to vector<2x1x8x8xf32>
    %207 = vector.shape_cast %206 : vector<2x1x8x8xf32> to vector<2x8x8xf32>
    %cst_86 = arith.constant 0.000000e+00 : f32
    %208 = vector.broadcast %cst_86 : f32 to vector<2x8x8xf32>
    %209 = arith.cmpf oeq, %207, %208 : vector<2x8x8xf32>
    %cst_87 = arith.constant -1.000000e+09 : f32
    %210 = vector.broadcast %cst_87 : f32 to vector<2x8x8xf32>
    %211 = arith.select %209, %210, %205 : vector<2x8x8xi1>, vector<2x8x8xf32>
    %cst_88 = arith.constant dense<0xFF800000> : vector<2x8xf32>
    %212 = vector.multi_reduction <maximumf>, %211, %cst_88 [2] : vector<2x8x8xf32> to vector<2x8xf32>
    %213 = vector.shape_cast %212 : vector<2x8xf32> to vector<2x8x1xf32>
    %214 = vector.broadcast %213 : vector<2x8x1xf32> to vector<2x8x8xf32>
    %215 = arith.subf %211, %214 : vector<2x8x8xf32>
    %216 = math.exp %215 : vector<2x8x8xf32>
    %cst_89 = arith.constant dense<0.000000e+00> : vector<2x8xf32>
    %217 = vector.multi_reduction <add>, %216, %cst_89 [2] : vector<2x8x8xf32> to vector<2x8xf32>
    %218 = vector.shape_cast %217 : vector<2x8xf32> to vector<2x8x1xf32>
    %219 = tpu.reciprocal %218 {approx = true} : vector<2x8x1xf32> -> vector<2x8x1xf32>
    %220 = vector.broadcast %219 : vector<2x8x1xf32> to vector<2x8x8xf32>
    %221 = arith.mulf %216, %220 : vector<2x8x8xf32>
    "tpu.trace_start"() <{level = 10 : i32, message = "bqk,bkd->bqd"}> : () -> ()
    %cst_90 = arith.constant dense<0.000000e+00> : vector<2x8x8xf32>
    %222 = tpu.matmul %221, %202, %cst_90 {dimension_numbers = #tpu.dot_dimension_numbers<[2], [1], [1], [2], [0, 0, 0, 1, 1, 2], [0], [0]>} : vector<2x8x8xf32>, vector<2x8x8xf32>, vector<2x8x8xf32> -> vector<2x8x8xf32>
    "tpu.trace_stop"() : () -> ()
    %223 = vector.extract_strided_slice %172 {offsets = [0, 0, 16], sizes = [2, 8, 8], strides = [1, 1, 1]} : vector<2x8x32xf32> to vector<2x8x8xf32>
    %224 = vector.extract_strided_slice %174 {offsets = [0, 0, 16], sizes = [2, 8, 8], strides = [1, 1, 1]} : vector<2x8x32xf32> to vector<2x8x8xf32>
    %225 = vector.extract_strided_slice %176 {offsets = [0, 0, 16], sizes = [2, 8, 8], strides = [1, 1, 1]} : vector<2x8x32xf32> to vector<2x8x8xf32>
    "tpu.trace_start"() <{level = 10 : i32, message = "bqd,bkd->bqk"}> : () -> ()
    %cst_91 = arith.constant dense<0.000000e+00> : vector<2x8x8xf32>
    %226 = tpu.matmul %223, %224, %cst_91 {dimension_numbers = #tpu.dot_dimension_numbers<[2], [2], [1], [1], [0, 0, 0, 1, 1, 1], [0], [0]>} : vector<2x8x8xf32>, vector<2x8x8xf32>, vector<2x8x8xf32> -> vector<2x8x8xf32>
    "tpu.trace_stop"() : () -> ()
    %cst_92 = arith.constant 0.353553385 : f32
    %227 = vector.broadcast %cst_92 : f32 to vector<2x8x8xf32>
    %228 = arith.mulf %226, %227 : vector<2x8x8xf32>
    %229 = vector.extract_strided_slice %171 {offsets = [0, 2, 0, 0], sizes = [2, 1, 8, 8], strides = [1, 1, 1, 1]} : vector<2x4x8x8xf32> to vector<2x1x8x8xf32>
    %230 = vector.shape_cast %229 : vector<2x1x8x8xf32> to vector<2x8x8xf32>
    %cst_93 = arith.constant 0.000000e+00 : f32
    %231 = vector.broadcast %cst_93 : f32 to vector<2x8x8xf32>
    %232 = arith.cmpf oeq, %230, %231 : vector<2x8x8xf32>
    %cst_94 = arith.constant -1.000000e+09 : f32
    %233 = vector.broadcast %cst_94 : f32 to vector<2x8x8xf32>
    %234 = arith.select %232, %233, %228 : vector<2x8x8xi1>, vector<2x8x8xf32>
    %cst_95 = arith.constant dense<0xFF800000> : vector<2x8xf32>
    %235 = vector.multi_reduction <maximumf>, %234, %cst_95 [2] : vector<2x8x8xf32> to vector<2x8xf32>
    %236 = vector.shape_cast %235 : vector<2x8xf32> to vector<2x8x1xf32>
    %237 = vector.broadcast %236 : vector<2x8x1xf32> to vector<2x8x8xf32>
    %238 = arith.subf %234, %237 : vector<2x8x8xf32>
    %239 = math.exp %238 : vector<2x8x8xf32>
    %cst_96 = arith.constant dense<0.000000e+00> : vector<2x8xf32>
    %240 = vector.multi_reduction <add>, %239, %cst_96 [2] : vector<2x8x8xf32> to vector<2x8xf32>
    %241 = vector.shape_cast %240 : vector<2x8xf32> to vector<2x8x1xf32>
    %242 = tpu.reciprocal %241 {approx = true} : vector<2x8x1xf32> -> vector<2x8x1xf32>
    %243 = vector.broadcast %242 : vector<2x8x1xf32> to vector<2x8x8xf32>
    %244 = arith.mulf %239, %243 : vector<2x8x8xf32>
    "tpu.trace_start"() <{level = 10 : i32, message = "bqk,bkd->bqd"}> : () -> ()
    %cst_97 = arith.constant dense<0.000000e+00> : vector<2x8x8xf32>
    %245 = tpu.matmul %244, %225, %cst_97 {dimension_numbers = #tpu.dot_dimension_numbers<[2], [1], [1], [2], [0, 0, 0, 1, 1, 2], [0], [0]>} : vector<2x8x8xf32>, vector<2x8x8xf32>, vector<2x8x8xf32> -> vector<2x8x8xf32>
    "tpu.trace_stop"() : () -> ()
    %246 = vector.extract_strided_slice %172 {offsets = [0, 0, 24], sizes = [2, 8, 8], strides = [1, 1, 1]} : vector<2x8x32xf32> to vector<2x8x8xf32>
    %247 = vector.extract_strided_slice %174 {offsets = [0, 0, 24], sizes = [2, 8, 8], strides = [1, 1, 1]} : vector<2x8x32xf32> to vector<2x8x8xf32>
    %248 = vector.extract_strided_slice %176 {offsets = [0, 0, 24], sizes = [2, 8, 8], strides = [1, 1, 1]} : vector<2x8x32xf32> to vector<2x8x8xf32>
    "tpu.trace_start"() <{level = 10 : i32, message = "bqd,bkd->bqk"}> : () -> ()
    %cst_98 = arith.constant dense<0.000000e+00> : vector<2x8x8xf32>
    %249 = tpu.matmul %246, %247, %cst_98 {dimension_numbers = #tpu.dot_dimension_numbers<[2], [2], [1], [1], [0, 0, 0, 1, 1, 1], [0], [0]>} : vector<2x8x8xf32>, vector<2x8x8xf32>, vector<2x8x8xf32> -> vector<2x8x8xf32>
    "tpu.trace_stop"() : () -> ()
    %cst_99 = arith.constant 0.353553385 : f32
    %250 = vector.broadcast %cst_99 : f32 to vector<2x8x8xf32>
    %251 = arith.mulf %249, %250 : vector<2x8x8xf32>
    %252 = vector.extract_strided_slice %171 {offsets = [0, 3, 0, 0], sizes = [2, 1, 8, 8], strides = [1, 1, 1, 1]} : vector<2x4x8x8xf32> to vector<2x1x8x8xf32>
    %253 = vector.shape_cast %252 : vector<2x1x8x8xf32> to vector<2x8x8xf32>
    %cst_100 = arith.constant 0.000000e+00 : f32
    %254 = vector.broadcast %cst_100 : f32 to vector<2x8x8xf32>
    %255 = arith.cmpf oeq, %253, %254 : vector<2x8x8xf32>
    %cst_101 = arith.constant -1.000000e+09 : f32
    %256 = vector.broadcast %cst_101 : f32 to vector<2x8x8xf32>
    %257 = arith.select %255, %256, %251 : vector<2x8x8xi1>, vector<2x8x8xf32>
    %cst_102 = arith.constant dense<0xFF800000> : vector<2x8xf32>
    %258 = vector.multi_reduction <maximumf>, %257, %cst_102 [2] : vector<2x8x8xf32> to vector<2x8xf32>
    %259 = vector.shape_cast %258 : vector<2x8xf32> to vector<2x8x1xf32>
    %260 = vector.broadcast %259 : vector<2x8x1xf32> to vector<2x8x8xf32>
    %261 = arith.subf %257, %260 : vector<2x8x8xf32>
    %262 = math.exp %261 : vector<2x8x8xf32>
    %cst_103 = arith.constant dense<0.000000e+00> : vector<2x8xf32>
    %263 = vector.multi_reduction <add>, %262, %cst_103 [2] : vector<2x8x8xf32> to vector<2x8xf32>
    %264 = vector.shape_cast %263 : vector<2x8xf32> to vector<2x8x1xf32>
    %265 = tpu.reciprocal %264 {approx = true} : vector<2x8x1xf32> -> vector<2x8x1xf32>
    %266 = vector.broadcast %265 : vector<2x8x1xf32> to vector<2x8x8xf32>
    %267 = arith.mulf %262, %266 : vector<2x8x8xf32>
    "tpu.trace_start"() <{level = 10 : i32, message = "bqk,bkd->bqd"}> : () -> ()
    %cst_104 = arith.constant dense<0.000000e+00> : vector<2x8x8xf32>
    %268 = tpu.matmul %267, %248, %cst_104 {dimension_numbers = #tpu.dot_dimension_numbers<[2], [1], [1], [2], [0, 0, 0, 1, 1, 2], [0], [0]>} : vector<2x8x8xf32>, vector<2x8x8xf32>, vector<2x8x8xf32> -> vector<2x8x8xf32>
    "tpu.trace_stop"() : () -> ()
    %269 = tpu.concatenate %199, %222, %245, %268 in 2 : vector<2x8x8xf32>, vector<2x8x8xf32>, vector<2x8x8xf32>, vector<2x8x8xf32> -> vector<2x8x32xf32>
    %270 = vector.shape_cast %269 : vector<2x8x32xf32> to vector<16x32xf32>
    %c0_105 = arith.constant 0 : index
    %c0_106 = arith.constant 0 : index
    %271 = vector.load %arg12[%c0_105, %c0_106] : memref<32x32xf32, #tpu.memory_space<vmem>>, vector<32x32xf32>
    %cst_107 = arith.constant dense<0.000000e+00> : vector<16x32xf32>
    %272 = tpu.matmul %270, %271, %cst_107 {dimension_numbers = #tpu.dot_dimension_numbers<[1], [0], [0], [1], [0, 0, 1, 1], [], []>} : vector<16x32xf32>, vector<32x32xf32>, vector<16x32xf32> -> vector<16x32xf32>
    %273 = arith.addf %138, %272 : vector<16x32xf32>
    %c0_108 = arith.constant 0 : index
    %c0_109 = arith.constant 0 : index
    %274 = vector.load %arg13[%c0_108, %c0_109] : memref<1x32xf32, #tpu.memory_space<vmem>>, vector<1x32xf32>
    %275 = vector.broadcast %274 : vector<1x32xf32> to vector<16x32xf32>
    %276 = arith.addf %273, %275 : vector<16x32xf32>
    %cst_110 = arith.constant dense<0.000000e+00> : vector<16xf32>
    %277 = vector.multi_reduction <add>, %276, %cst_110 [1] : vector<16x32xf32> to vector<16xf32>
    %278 = vector.shape_cast %277 : vector<16xf32> to vector<16x1xf32>
    %cst_111 = arith.constant 3.200000e+01 : f32
    %279 = vector.broadcast %cst_111 : f32 to vector<16x1xf32>
    %280 = arith.divf %278, %279 : vector<16x1xf32>
    %281 = vector.broadcast %280 : vector<16x1xf32> to vector<16x32xf32>
    %282 = arith.subf %276, %281 : vector<16x32xf32>
    %283 = arith.mulf %282, %282 : vector<16x32xf32>
    %cst_112 = arith.constant dense<0.000000e+00> : vector<16xf32>
    %284 = vector.multi_reduction <add>, %283, %cst_112 [1] : vector<16x32xf32> to vector<16xf32>
    %285 = vector.shape_cast %284 : vector<16xf32> to vector<16x1xf32>
    %cst_113 = arith.constant 3.100000e+01 : f32
    %286 = vector.broadcast %cst_113 : f32 to vector<16x1xf32>
    %287 = arith.divf %285, %286 : vector<16x1xf32>
    %288 = math.sqrt %287 : vector<16x1xf32>
    %c2 = arith.constant 2 : index
    %c0_114 = arith.constant 0 : index
    %289 = memref.load %arg18[%c2, %c0_114] : memref<3x2xf32, #tpu.memory_space<smem>>
    %290 = vector.broadcast %289 : f32 to vector<16x32xf32>
    %291 = arith.mulf %290, %282 : vector<16x32xf32>
    %cst_115 = arith.constant 9.99999997E-7 : f32
    %292 = vector.broadcast %cst_115 : f32 to vector<16x1xf32>
    %293 = arith.addf %288, %292 : vector<16x1xf32>
    %294 = vector.broadcast %293 : vector<16x1xf32> to vector<16x32xf32>
    %295 = arith.divf %291, %294 : vector<16x32xf32>
    %c2_116 = arith.constant 2 : index
    %c1_117 = arith.constant 1 : index
    %296 = memref.load %arg18[%c2_116, %c1_117] : memref<3x2xf32, #tpu.memory_space<smem>>
    %297 = vector.broadcast %296 : f32 to vector<16x32xf32>
    %298 = arith.addf %295, %297 : vector<16x32xf32>
    %c0_118 = arith.constant 0 : index
    %c0_119 = arith.constant 0 : index
    %299 = vector.load %arg14[%c0_118, %c0_119] : memref<32x64xf32, #tpu.memory_space<vmem>>, vector<32x64xf32>
    %cst_120 = arith.constant dense<0.000000e+00> : vector<16x64xf32>
    %300 = tpu.matmul %298, %299, %cst_120 {dimension_numbers = #tpu.dot_dimension_numbers<[1], [0], [0], [1], [0, 0, 1, 1], [], []>} : vector<16x32xf32>, vector<32x64xf32>, vector<16x64xf32> -> vector<16x64xf32>
    %c0_121 = arith.constant 0 : index
    %c0_122 = arith.constant 0 : index
    %301 = vector.load %arg15[%c0_121, %c0_122] : memref<1x64xf32, #tpu.memory_space<vmem>>, vector<1x64xf32>
    %302 = vector.broadcast %301 : vector<1x64xf32> to vector<16x64xf32>
    %303 = arith.addf %300, %302 : vector<16x64xf32>
    %cst_123 = arith.constant 0.000000e+00 : f32
    %304 = vector.broadcast %cst_123 : f32 to vector<16x64xf32>
    %305 = arith.maximumf %303, %304 : vector<16x64xf32>
    %c0_124 = arith.constant 0 : index
    %c0_125 = arith.constant 0 : index
    %306 = vector.load %arg16[%c0_124, %c0_125] : memref<64x32xf32, #tpu.memory_space<vmem>>, vector<64x32xf32>
    %cst_126 = arith.constant dense<0.000000e+00> : vector<16x32xf32>
    %307 = tpu.matmul %305, %306, %cst_126 {dimension_numbers = #tpu.dot_dimension_numbers<[1], [0], [0], [1], [0, 0, 1, 1], [], []>} : vector<16x64xf32>, vector<64x32xf32>, vector<16x32xf32> -> vector<16x32xf32>
    %308 = arith.addf %276, %307 : vector<16x32xf32>
    %c0_127 = arith.constant 0 : index
    %c0_128 = arith.constant 0 : index
    %309 = vector.load %arg17[%c0_127, %c0_128] : memref<1x32xf32, #tpu.memory_space<vmem>>, vector<1x32xf32>
    %310 = vector.broadcast %309 : vector<1x32xf32> to vector<16x32xf32>
    %311 = arith.addf %308, %310 : vector<16x32xf32>
    %312 = vector.shape_cast %311 : vector<16x32xf32> to vector<2x8x32xf32>
    %c0_129 = arith.constant 0 : index
    %c0_130 = arith.constant 0 : index
    %c0_131 = arith.constant 0 : index
    %313 = vector.load %arg19[%c0_129, %c0_130, %c0_131] : memref<2x8x32xf32, #tpu.memory_space<vmem>>, vector<2x8x32xf32>
    tpu.vector_store %arg19[%c0_129, %c0_130, %c0_131], %312 {strides = array<i32>} : memref<2x8x32xf32, #tpu.memory_space<vmem>>, vector<2x8x32xf32>,
    return
  }
}

</mosaic_0001>

<bundles_post_ra>
// kernel: decoder_block.1
= control target key start
LH: loop header
LB: loop body
LE: loop exit
PB: predicated region body
PF: predicated region fallthrough
CT: control target
= control target key end

     0   :  { %s5004_s0 = inlined_call_operand.vmem [shape: f32[2,8,32], index: 0, kind: input, shape index: {}]   ;;  %s5005_s1 = inlined_call_operand.vmem [shape: f32[2,8,32], index: 1, kind: input, shape index: {}]   ;;  %s5006_s2 = inlined_call_operand.vmem [shape: f32[2,4,8,8], index: 2, kind: input, shape index: {}]   ;;  %s5007_s3 = inlined_call_operand.vmem [shape: f32[2,4,8,8], index: 3, kind: input, shape index: {}]   ;;  %s5008_s4 = inlined_call_operand.vmem [shape: f32[32,96], index: 4, kind: input, shape index: {}]   ;;  %s5009_s5 = inlined_call_operand.vmem [shape: f32[1,96], index: 5, kind: input, shape index: {}]   ;;  %s5010_s6 = inlined_call_operand.vmem [shape: f32[32,32], index: 6, kind: input, shape index: {}]   ;;  %s5011_s7 = inlined_call_operand.vmem [shape: f32[1,32], index: 7, kind: input, shape index: {}]   ;;  %s5012_s8 = inlined_call_operand.vmem [shape: f32[32,32], index: 8, kind: input, shape index: {}]   ;;  %s5013_s9 = inlined_call_operand.vmem [shape: f32[1,32], index: 9, kind: input, shape index: {}]   ;;  %s5014_s10 = inlined_call_operand.vmem [shape: f32[32,64], index: 10, kind: input, shape index: {}]   ;;  %s5015_s11 = inlined_call_operand.vmem [shape: f32[1,64], index: 11, kind: input, shape index: {}]   ;;  %s5016_s12 = inlined_call_operand.vmem [shape: f32[32,32], index: 12, kind: input, shape index: {}]   ;;  %s5017_s13 = inlined_call_operand.vmem [shape: f32[1,32], index: 13, kind: input, shape index: {}]   ;;  %s5018_s14 = inlined_call_operand.vmem [shape: f32[32,64], index: 14, kind: input, shape index: {}]   ;;  %s5019_s15 = inlined_call_operand.vmem [shape: f32[1,64], index: 15, kind: input, shape index: {}]   ;;  %s5020_s16 = inlined_call_operand.vmem [shape: f32[64,32], index: 16, kind: input, shape index: {}]   ;;  %s5021_s17 = inlined_call_operand.vmem [shape: f32[1,32], index: 17, kind: input, shape index: {}]   ;;  %s5022_s18 = inlined_call_operand.vmem [shape: f32[3,2], index: 18, kind: input, shape index: {}]   ;;  %s5023_s19 = inlined_call_operand.hbm [shape: f32[2,8,32], index: 19, kind: output, shape index: {}]  }
   0x1   :  { %5030 = sst [smem:[#allocation8_spill]] %s5004_s0 }
   0x2   :  { %5031 = sst [smem:[#allocation9_spill]] %s5005_s1 }
   0x3   :  { %5032 = sst [smem:[#allocation10_spill]] %s5006_s2 }
   0x4   :  { %5033 = sst [smem:[#allocation11_spill]] %s5007_s3 }
   0x5   :  { %24 = vsyncpa [#allocation4], 0 }
   0x6   :  { %25 = vsyncpa [#allocation3], 0  ;;  %s68_s20 = sshll.u32 %s5022_s18, 4  ;;  %s69_s20 = int_to_ptr.vmem [resolvable:$true] %s68_s20 }
   0x7   :  { %s4270_s21 = scalar_lea.vmem %s69_s20, 64  ;;  %p4275_p1 = scmp.lt.s32.totalorder %s69_s20, %s69_s20 }
   0x8   :  { %p4271_p0 = scmp.ne.s32.totalorder %s69_s20, %s4270_s21  ;;  %p4276_p2 = scmp.lt.s32.totalorder %s4270_s21, %s4270_s21 }
   0xa   :  { %p4277_p3 = por %p4276_p2, %p4275_p1 }
   0xc   :  { %p4278_p4 = pnand %p4277_p3, %p4271_p0 }
   0xe   :  { %4281 = shalt.err (!%p4278_p4)
}
   0xf   :  { %s4308_s1 = smov [#allocation2]  }
  0x10   :  { %71 = dma.vmem_to_smem %s69_s20, 64, %s4308_s1, [#allocation4]  }
  0x11   :  { %4304 = dma.done.wait [#allocation4], 64  }
  0x12   :  { %4305 = vsyncadd [#allocation4], 4294967232 }
  0x13   :  { %75 = sfence }
  0x14   :  { %s5034_s23 = sld [smem:[#allocation8_spill]]  ;;  %vm80_vm0 = vcmask 261120   ;;  %v131_v14 = vld [vmem:[%s5008_s4] sm:$0xff]  ;;  %v132_v15 = vld [vmem:[%s5008_s4 + $0x8] sm:$0xff]  ;;  %v133_v16 = vld [vmem:[%s5008_s4 + $0x10] sm:$0xff]  ;;  %s3670_s20 = sld [smem:[#allocation2 + $0x1]] }
  0x15   :  { %v4099_v17 = vpack.c.bf16 %v132_v15, %v131_v14  ;;  %v134_v18 = vld [vmem:[%s5008_s4 + $0x18] sm:$0xff]  ;;  %s117_s4 = sld [smem:[#allocation2]]  ;;  %v4309_v46 = vmov 0.0   ;;  %vm4310_vm5 = vmmov 0   ;;  %v3671_v47 = vld [vmem:[%s5009_s5] ss:$0 sm:$0xff] }
  0x16   :  { %v4103_v19 = vpack.c.bf16 %v134_v18, %v133_v16  ;;  %3875 = vmatprep.subr.mxu0 %v4309_v46  ;;  %3877 = vmatprep.mubr.msk.f32.mxu0 %vm4310_vm5, %v4309_v46  ;;  %s4311_s22 = smov 96   ;;  %vm234_vm6 = vcmask 64512   ;;  %s4312_s25 = smov 64   ;;  %vm1603_vm15 = vcmask 195584  }
  0x17   :  { %4100 = vmatprep.subr.bf16.mxu1 %v4099_v17  ;;  %s4313_s3 = smov 88   ;;  %s4314_s26 = smov 120  }
  0x18   :  { %4102 = vmatpush3.bf16.msra.mxu1 %v4099_v17  ;;  %s4315_s30 = smov 56   ;;  %s4318_s18 = smov 48  }
  0x19   :  { %4104 = vmatprep.subr.bf16.mxu1 %v4103_v19  ;;  %s4319_s24 = smov 72   ;;  %s4322_s21 = smov 8  }
  0x1a   :  { %v4433_v0 = vld [vmem:[%s5034_s23] sm:$0xff]  ;;  %v4438_v1 = vld [vmem:[%s5034_s23 + $0x8] sm:$0xff]  ;;  %v128_v39 = vstv %s3670_s20  ;;  %s5035_s23 = sld [smem:[#allocation10_spill]]  ;;  %s4317_s20 = smov 112  }
  0x1b   :  { %v81_v2 = vsel %vm80_vm0, %v4433_v0, 0.0  ;;  %v84_v3 = vsel %vm80_vm0, %v4438_v1, 0.0  ;;  %v118_v36 = vstv %s117_s4  ;;  %s4316_s4 = smov 80   ;;  %s3736_s2 = sld [smem:[#allocation2 + $0x100]] }
  0x1c   :  { %82 = vadd.xlane.f32.xlu0 %v81_v2  ;;  %4106 = vmatpush3.bf16.msra.mxu1 %v4103_v19 }
  0x1d   :  { %3865 = vmatprep.subr.mxu1 %v4309_v46 }
  0x20   :  { %85 = vadd.xlane.f32.xlu0 %v84_v3  ;;  %v223_v54 = vld [vmem:[%s5035_s23] sm:$0xff] }
  0x21   :  { %vm388_vm7 = vcmp.eq.f32.partialorder %v223_v54, 0.0  ;;  %v227_v58 = vld [vmem:[%s5035_s23 + $0x20] sm:$0xff] }
  0x22   :  { %vm389_vm8 = vcmp.eq.f32.partialorder %v227_v58, 0.0 }
  0xa9   :  { %v83_v4 = vpop.xlane.xlu0 %82 }
  0xaa   :  { %v88_v5 = vmul.f32 0.03125, %v83_v4 }
  0xac   :  { %v90_v6 = vsub.f32 %v4433_v0, %v88_v5 }
  0xad   :  { %v86_v7 = vpop.xlane.xlu0 %85 }
  0xae   :  { %v89_v8 = vmul.f32 0.03125, %v86_v7  ;;  %v92_v9 = vmul.f32 %v90_v6, %v90_v6  ;;  %v119_v37 = vmul.f32 %v118_v36, %v90_v6 }
  0xb0   :  { %v91_v10 = vsub.f32 %v4438_v1, %v89_v8  ;;  %v94_v11 = vsel %vm80_vm0, %v92_v9, 0.0 }
  0xb1   :  { %95 = vadd.xlane.f32.xlu1 %v94_v11 }
  0xb2   :  { %v93_v12 = vmul.f32 %v91_v10, %v91_v10  ;;  %v120_v41 = vmul.f32 %v118_v36, %v91_v10 }
  0xb4   :  { %v97_v13 = vsel %vm80_vm0, %v93_v12, 0.0 }
  0xb5   :  { %98 = vadd.xlane.f32.xlu1 %v97_v13 }
 0x13e   :  { %v96_v20 = vpop.xlane.xlu1 %95 }
 0x13f   :  { %v101_v21 = vmul.f32 0.032258064, %v96_v20 }
 0x141   :  { %4182 = vrsqrt.f32 %v101_v21  ;;  %vm105_vm1 = vcmp.eq.f32.partialorder %v101_v21, inf  ;;  %v108_v26 = vand.u32 2147483648, %v101_v21  ;;  %vm107_vm2 = vcmp.eq.f32.partialorder %v101_v21, 0.0 }
 0x142   :  { %v99_v22 = vpop.xlane.xlu1 %98 }
 0x143   :  { %v102_v23 = vmul.f32 0.032258064, %v99_v22 }
 0x145   :  { %4184 = vrsqrt.f32 %v102_v23  ;;  %vm112_vm3 = vcmp.eq.f32.partialorder %v102_v23, inf  ;;  %v115_v32 = vand.u32 2147483648, %v102_v23  ;;  %vm114_vm4 = vcmp.eq.f32.partialorder %v102_v23, 0.0 }
 0x14b   :  { %v4183_v24 = vpop.eup %4182 }
 0x14c   :  { %v104_v25 = vmul.f32 %v4183_v24, %v101_v21 }
 0x14e   :  { %v106_v27 = vsel %vm105_vm1, %v101_v21, %v104_v25  ;;  %vm1600_vm1 = vcmask 130048  }
 0x14f   :  { %v4185_v28 = vpop.eup %4184  ;;  %v109_v29 = vsel %vm107_vm2, %v108_v26, %v106_v27 }
 0x150   :  { %v111_v30 = vmul.f32 %v4185_v28, %v102_v23  ;;  %v121_v31 = vadd.f32 1e-06, %v109_v29  ;;  %v224_v28 = vld [vmem:[%s5035_s23 + $0x8] sm:$0xff] }
 0x151   :  { %vm724_vm9 = vcmp.eq.f32.partialorder %v224_v28, 0.0 }
 0x152   :  { %v113_v33 = vsel %vm112_vm3, %v102_v23, %v111_v30  ;;  %4186 = vrcp.f32 %v121_v31 }
 0x153   :  { %v116_v34 = vsel %vm114_vm4, %v115_v32, %v113_v33 }
 0x154   :  { %v122_v35 = vadd.f32 1e-06, %v116_v34  ;;  %v228_v34 = vld [vmem:[%s5035_s23 + $0x28] sm:$0xff] }
 0x155   :  { %vm725_vm10 = vcmp.eq.f32.partialorder %v228_v34, 0.0 }
 0x156   :  { %4188 = vrcp.f32 %v122_v35 }
 0x15c   :  { %v4187_v38 = vpop.eup %4186 }
 0x15d   :  { %v124_v40 = vmul.f32 %v4187_v38, %v119_v37 }
 0x15f   :  { %v129_v42 = vadd.f32 %v128_v39, %v124_v40 }
 0x160   :  { %v4189_v43 = vpop.eup %4188 }
 0x161   :  { %v126_v44 = vmul.f32 %v4189_v43, %v120_v41  ;;  %3862 = vmatprep.mubr.msk.f32.mxu1 %vm80_vm0, %v129_v42 }
 0x163   :  { %v130_v45 = vadd.f32 %v128_v39, %v126_v44 }
 0x165   :  { %3863 = vmatmul.mubr.msk.f32.vlgmr.msra.gmra.mrb[0].mxu1 %vm80_vm0, %v130_v45 }
 0x166   :  { %3867 = vmatprep.mubr.msk.f32.mxu1 %vm4310_vm5, %v4309_v46 }
 0x238   :  { %v3864_v48 = vpop.f32.mrb[0].mxu1 }
 0x239   :  { %v4471_v49 = vadd.f32 %v3864_v48, %v3671_v47  ;;  %v214_v50 = vpop.f32.mrb[1].mxu1 }
 0x23a   :  { %v4473_v51 = vadd.f32 %v3671_v47, %v214_v50 }
 0x23b   :  { %310 = vrot.lane.b32.xlu1 %v4471_v49, %s4311_s22 }
 0x23c   :  { %232 = vrot.lane.b32.xlu0 %v4473_v51, %s4311_s22 }
 0x2ad   :  { %v311_v53 = vpop.permute.xlu1 %310 }
 0x2ae   :  { %v233_v52 = vpop.permute.xlu0 %232 }
 0x2af   :  { %3866 = vmatpush3.xpose.msk.msra.mxu1 %vm234_vm6, %v233_v52 }
 0x2b0   :  { %3870 = vmatprep.subr.mxu1 %v4309_v46 }
 0x2b2   :  { %3868 = vmatmul.mubr.msk.f32.vlgmr.msra.gmra.mrb[2].mxu1 %vm234_vm6, %v4473_v51 }
 0x2b3   :  { %3871 = vmatpush3.xpose.msk.msra.mxu1 %vm234_vm6, %v311_v53  ;;  %3872 = vmatprep.mubr.msk.f32.mxu1 %vm4310_vm5, %v4309_v46 }
 0x2b4   :  { %3880 = vmatprep.subr.mxu1 %v4309_v46 }
 0x2b6   :  { %3873 = vmatmul.mubr.msk.f32.vlgmr.msra.gmra.mrb[4].mxu1 %vm234_vm6, %v4471_v49 }
 0x2b7   :  { %3882 = vmatprep.mubr.msk.f32.mxu1 %vm4310_vm5, %v4309_v46 }
 0x385   :  { %v305_v55 = vpop.f32.mrb[2].mxu1 }
 0x386   :  { %v386_v56 = vmul.f32 0.35355338, %v305_v55  ;;  %v3869_v57 = vpop.f32.mrb[3].mxu1 }
 0x388   :  { %v390_v59 = vsel %vm388_vm7, -1e+09, %v386_v56 }
 0x389   :  { %v382_v60 = vpop.f32.mrb[4].mxu1  ;;  %v392_v61 = vsel %vm234_vm6, %v390_v59, -inf }
 0x38a   :  { %v387_v62 = vmul.f32 0.35355338, %v382_v60  ;;  %393 = vmax.xlane.f32.xlu1 %v392_v61  ;;  %v3874_v63 = vpop.f32.mrb[5].mxu1 }
 0x38c   :  { %v391_v2 = vsel %vm389_vm8, -1e+09, %v387_v62 }
 0x38d   :  { %v395_v3 = vsel %vm234_vm6, %v391_v2, -inf }
 0x38e   :  { %396 = vmax.xlane.f32.xlu0 %v395_v3 }
 0x39b   :  { %490 = vrot.lane.b32.xlu1 %v4471_v49, %s4312_s25 }
 0x39f   :  { %568 = vrot.lane.b32.xlu1 %v4473_v51, %s4313_s3 }
 0x3a3   :  { %646 = vrot.lane.b32.xlu1 %v4471_v49, %s4313_s3 }
 0x3a4   :  { %414 = vrot.lane.b32.xlu0 %v4473_v51, %s4312_s25  ;;  %s4320_s25 = smov 104  }
 0x417   :  { %v394_v4 = vpop.xlane.xlu1 %393 }
 0x418   :  { %v398_v5 = vsub.f32 %v390_v59, %v394_v4 }
 0x41a   :  { %v400_v6 = vmul.f32 1.442695, %v398_v5 }
 0x41b   :  { %v491_v7 = vpop.permute.xlu1 %490  ;;  %v397_v8 = vpop.xlane.xlu0 %396 }
 0x41c   :  { %4190 = vpow2.f32 %v400_v6  ;;  %v399_v9 = vsub.f32 %v391_v2, %v397_v8  ;;  %3881 = vmatpush3.msra.mxu1 %v491_v7  ;;  %v225_v7 = vld [vmem:[%s5035_s23 + $0x10] sm:$0xff] }
 0x41d   :  { %3890 = vmatprep.subr.mxu1 %v4309_v46  ;;  %vm1060_vm11 = vcmp.eq.f32.partialorder %v225_v7, 0.0 }
 0x41e   :  { %v402_v10 = vmul.f32 1.442695, %v399_v9 }
 0x41f   :  { %v415_v11 = vpop.permute.xlu0 %414  ;;  %v569_v16 = vpop.permute.xlu1 %568 }
 0x420   :  { %4192 = vpow2.f32 %v402_v10  ;;  %3876 = vmatpush3.msra.mxu0 %v415_v11 }
 0x421   :  { %3885 = vmatprep.subr.mxu0 %v4309_v46 }
 0x423   :  { %v647_v17 = vpop.permute.xlu1 %646 }
 0x426   :  { %v4191_v12 = vpop.eup %4190 }
 0x427   :  { %v404_v13 = vsel %vm234_vm6, %v4191_v12, 0.0 }
 0x428   :  { %405 = vadd.xlane.f32.xlu0 %v404_v13  ;;  %v229_v13 = vld [vmem:[%s5035_s23 + $0x30] sm:$0xff] }
 0x429   :  { %vm1061_vm12 = vcmp.eq.f32.partialorder %v229_v13, 0.0 }
 0x42a   :  { %v4193_v14 = vpop.eup %4192 }
 0x42b   :  { %v407_v15 = vsel %vm234_vm6, %v4193_v14, 0.0 }
 0x42c   :  { %408 = vadd.xlane.f32.xlu1 %v407_v15 }
 0x43d   :  { %644 = vrot.lane.b32.xlu1 %v4471_v49, %s4314_s26 }
 0x43e   :  { %566 = vrot.lane.b32.xlu0 %v4473_v51, %s4314_s26 }
 0x4b5   :  { %v406_v18 = vpop.xlane.xlu0 %405 }
 0x4b6   :  { %4194 = vrcp.f32 %v406_v18 }
 0x4b9   :  { %v409_v19 = vpop.xlane.xlu1 %408  ;;  %v567_v24 = vpop.permute.xlu0 %566 }
 0x4ba   :  { %4196 = vrcp.f32 %v409_v19 }
 0x4bd   :  { %v645_v25 = vpop.permute.xlu1 %644 }
 0x4c0   :  { %v4195_v20 = vpop.eup %4194 }
 0x4c1   :  { %v412_v21 = vmul.f32 %v4195_v20, %v4191_v12 }
 0x4c3   :  { %3878 = vmatmul.mubr.msk.f32.vlgmr.msra.gmra.mrb[0].mxu0 %vm234_vm6, %v412_v21 }
 0x4c4   :  { %v4197_v22 = vpop.eup %4196  ;;  %3886 = vmatpush3.xpose.msk.msra.mxu0 %vm234_vm6, %v569_v16  ;;  %3887 = vmatprep.mubr.msk.f32.mxu0 %vm4310_vm5, %v4309_v46 }
 0x4c5   :  { %v413_v23 = vmul.f32 %v4197_v22, %v4193_v14  ;;  %3895 = vmatprep.subr.mxu0 %v4309_v46 }
 0x4c7   :  { %3883 = vmatmul.mubr.msk.f32.vlgmr.msra.gmra.mrb[6].mxu1 %vm234_vm6, %v413_v23  ;;  %3888 = vmatmul.mubr.msk.f32.vlgmr.msra.gmra.mrb[2].mxu0 %vm234_vm6, %v567_v24 }
 0x4c8   :  { %3891 = vmatpush3.xpose.msk.msra.mxu1 %vm234_vm6, %v647_v17  ;;  %3892 = vmatprep.mubr.msk.f32.mxu1 %vm4310_vm5, %v4309_v46 }
 0x4c9   :  { %3900 = vmatprep.subr.mxu1 %v4309_v46  ;;  %3897 = vmatprep.mubr.msk.f32.mxu0 %vm4310_vm5, %v4309_v46 }
 0x4cb   :  { %3893 = vmatmul.mubr.msk.f32.vlgmr.msra.gmra.mrb[8].mxu1 %vm234_vm6, %v645_v25 }
 0x4cc   :  { %3902 = vmatprep.mubr.msk.f32.mxu1 %vm4310_vm5, %v4309_v46 }
 0x596   :  { %v4529_v26 = vpop.f32.mrb[0].mxu0 }
 0x597   :  { %v3879_v27 = vpop.f32.mrb[1].mxu0 }
 0x59a   :  { %v4534_v29 = vpop.f32.mrb[6].mxu1  ;;  %v640_v30 = vpop.f32.mrb[2].mxu0 }
 0x59b   :  { %v722_v31 = vmul.f32 0.35355338, %v640_v30  ;;  %v3884_v32 = vpop.f32.mrb[7].mxu1  ;;  %v3889_v33 = vpop.f32.mrb[3].mxu0 }
 0x59d   :  { %v726_v35 = vsel %vm724_vm9, -1e+09, %v722_v31 }
 0x59e   :  { %v718_v36 = vpop.f32.mrb[8].mxu1  ;;  %v728_v37 = vsel %vm234_vm6, %v726_v35, -inf }
 0x59f   :  { %v723_v38 = vmul.f32 0.35355338, %v718_v36  ;;  %729 = vmax.xlane.f32.xlu0 %v728_v37  ;;  %v3894_v39 = vpop.f32.mrb[9].mxu1 }
 0x5a1   :  { %v727_v40 = vsel %vm725_vm10, -1e+09, %v723_v38 }
 0x5a2   :  { %v731_v41 = vsel %vm234_vm6, %v727_v40, -inf }
 0x5a3   :  { %732 = vmax.xlane.f32.xlu1 %v731_v41 }
 0x5b4   :  { %826 = vrot.lane.b32.xlu1 %v4471_v49, %s4315_s30 }
 0x5b5   :  { %750 = vrot.lane.b32.xlu0 %v4473_v51, %s4315_s30  ;;  %s4321_s30 = smov 40  }
 0x5b8   :  { %904 = vrot.lane.b32.xlu1 %v4473_v51, %s4316_s4 }
 0x5bc   :  { %982 = vrot.lane.b32.xlu1 %v4471_v49, %s4316_s4 }
 0x5c0   :  { %980 = vrot.lane.b32.xlu1 %v4471_v49, %s4317_s20 }
 0x62c   :  { %v730_v42 = vpop.xlane.xlu0 %729 }
 0x62d   :  { %v734_v43 = vsub.f32 %v726_v35, %v730_v42 }
 0x62f   :  { %v736_v44 = vmul.f32 1.442695, %v734_v43 }
 0x630   :  { %v751_v45 = vpop.permute.xlu0 %750  ;;  %v733_v47 = vpop.xlane.xlu1 %732 }
 0x631   :  { %4198 = vpow2.f32 %v736_v44  ;;  %v735_v48 = vsub.f32 %v727_v40, %v733_v47  ;;  %3896 = vmatpush3.msra.mxu0 %v751_v45 }
 0x632   :  { %3905 = vmatprep.subr.mxu0 %v4309_v46 }
 0x633   :  { %v738_v50 = vmul.f32 1.442695, %v735_v48  ;;  %v226_v48 = vld [vmem:[%s5035_s23 + $0x18] sm:$0xff] }
 0x634   :  { %v827_v52 = vpop.permute.xlu1 %826  ;;  %vm1396_vm13 = vcmp.eq.f32.partialorder %v226_v48, 0.0 }
 0x635   :  { %4200 = vpow2.f32 %v738_v50  ;;  %3901 = vmatpush3.msra.mxu1 %v827_v52 }
 0x636   :  { %3910 = vmatprep.subr.mxu1 %v4309_v46 }
 0x638   :  { %v905_v59 = vpop.permute.xlu1 %904 }
 0x63b   :  { %v4199_v53 = vpop.eup %4198 }
 0x63c   :  { %v740_v54 = vsel %vm234_vm6, %v4199_v53, 0.0  ;;  %v983_v63 = vpop.permute.xlu1 %982 }
 0x63d   :  { %741 = vadd.xlane.f32.xlu0 %v740_v54 }
 0x63f   :  { %v4201_v55 = vpop.eup %4200 }
 0x640   :  { %v743_v56 = vsel %vm234_vm6, %v4201_v55, 0.0  ;;  %v981_v4 = vpop.permute.xlu1 %980 }
 0x641   :  { %744 = vadd.xlane.f32.xlu0 %v743_v56  ;;  %v230_v56 = vld [vmem:[%s5035_s23 + $0x38] sm:$0xff]  ;;  %s4323_s23 = smov 16  }
 0x642   :  { %vm1397_vm14 = vcmp.eq.f32.partialorder %v230_v56, 0.0 }
 0x657   :  { %902 = vrot.lane.b32.xlu0 %v4473_v51, %s4317_s20 }
 0x6ca   :  { %v742_v57 = vpop.xlane.xlu0 %741 }
 0x6cb   :  { %4202 = vrcp.f32 %v742_v57 }
 0x6ce   :  { %v745_v58 = vpop.xlane.xlu0 %744 }
 0x6cf   :  { %4204 = vrcp.f32 %v745_v58 }
 0x6d2   :  { %v903_v3 = vpop.permute.xlu0 %902 }
 0x6d5   :  { %v4203_v60 = vpop.eup %4202 }
 0x6d6   :  { %v748_v61 = vmul.f32 %v4203_v60, %v4199_v53 }
 0x6d8   :  { %3898 = vmatmul.mubr.msk.f32.vlgmr.msra.gmra.mrb[4].mxu0 %vm234_vm6, %v748_v61 }
 0x6d9   :  { %v4205_v62 = vpop.eup %4204  ;;  %3906 = vmatpush3.xpose.msk.msra.mxu0 %vm234_vm6, %v905_v59  ;;  %3907 = vmatprep.mubr.msk.f32.mxu0 %vm4310_vm5, %v4309_v46 }
 0x6da   :  { %v749_v2 = vmul.f32 %v4205_v62, %v4201_v55  ;;  %3915 = vmatprep.subr.mxu0 %v4309_v46 }
 0x6dc   :  { %3903 = vmatmul.mubr.msk.f32.vlgmr.msra.gmra.mrb[10].mxu1 %vm234_vm6, %v749_v2  ;;  %3908 = vmatmul.mubr.msk.f32.vlgmr.msra.gmra.mrb[6].mxu0 %vm234_vm6, %v903_v3 }
 0x6dd   :  { %3911 = vmatpush3.xpose.msk.msra.mxu1 %vm234_vm6, %v983_v63  ;;  %3912 = vmatprep.mubr.msk.f32.mxu1 %vm4310_vm5, %v4309_v46 }
 0x6de   :  { %3920 = vmatprep.subr.mxu1 %v4309_v46  ;;  %3917 = vmatprep.mubr.msk.f32.mxu0 %vm4310_vm5, %v4309_v46 }
 0x6e0   :  { %3913 = vmatmul.mubr.msk.f32.vlgmr.msra.gmra.mrb[12].mxu1 %vm234_vm6, %v981_v4 }
 0x6e1   :  { %3922 = vmatprep.mubr.msk.f32.mxu1 %vm4310_vm5, %v4309_v46 }
 0x7ab   :  { %v4571_v5 = vpop.f32.mrb[4].mxu0 }
 0x7ac   :  { %v3899_v6 = vpop.f32.mrb[5].mxu0 }
 0x7af   :  { %v4576_v8 = vpop.f32.mrb[10].mxu1  ;;  %v976_v9 = vpop.f32.mrb[6].mxu0 }
 0x7b0   :  { %v1058_v10 = vmul.f32 0.35355338, %v976_v9  ;;  %v3904_v11 = vpop.f32.mrb[11].mxu1  ;;  %v3909_v12 = vpop.f32.mrb[7].mxu0 }
 0x7b2   :  { %v1062_v14 = vsel %vm1060_vm11, -1e+09, %v1058_v10 }
 0x7b3   :  { %v1054_v15 = vpop.f32.mrb[12].mxu1  ;;  %v1064_v16 = vsel %vm234_vm6, %v1062_v14, -inf }
 0x7b4   :  { %v1059_v17 = vmul.f32 0.35355338, %v1054_v15  ;;  %1065 = vmax.xlane.f32.xlu0 %v1064_v16  ;;  %v3914_v18 = vpop.f32.mrb[13].mxu1 }
 0x7b6   :  { %v1063_v19 = vsel %vm1061_vm12, -1e+09, %v1059_v17 }
 0x7b7   :  { %v1067_v20 = vsel %vm234_vm6, %v1063_v19, -inf }
 0x7b8   :  { %1068 = vmax.xlane.f32.xlu1 %v1067_v20 }
 0x7c9   :  { %1162 = vrot.lane.b32.xlu1 %v4471_v49, %s4318_s18 }
 0x7ca   :  { %1086 = vrot.lane.b32.xlu0 %v4473_v51, %s4318_s18  ;;  %s5036_s18 = sld [smem:[#allocation9_spill]] }
 0x7cd   :  { %1240 = vrot.lane.b32.xlu1 %v4473_v51, %s4319_s24 }
 0x7d1   :  { %1318 = vrot.lane.b32.xlu1 %v4471_v49, %s4319_s24 }
 0x7d5   :  { %1316 = vrot.lane.b32.xlu1 %v4471_v49, %s4320_s25 }
 0x841   :  { %v1066_v21 = vpop.xlane.xlu0 %1065 }
 0x842   :  { %v1070_v22 = vsub.f32 %v1062_v14, %v1066_v21  ;;  %v1608_v21 = vld [vmem:[%s5010_s6 + $0x10] sm:$0xff] }
 0x844   :  { %v1072_v23 = vmul.f32 1.442695, %v1070_v22  ;;  %v1609_v22 = vld [vmem:[%s5010_s6 + $0x18] sm:$0xff] }
 0x845   :  { %v1087_v24 = vpop.permute.xlu0 %1086  ;;  %v1069_v25 = vpop.xlane.xlu1 %1068 }
 0x846   :  { %4206 = vpow2.f32 %v1072_v23  ;;  %v1071_v27 = vsub.f32 %v1063_v19, %v1069_v25  ;;  %3916 = vmatpush3.msra.mxu0 %v1087_v24  ;;  %v1607_v19 = vld [vmem:[%s5010_s6 + $0x8] sm:$0xff]  ;;  %v4111_v23 = vpack.c.bf16 %v1609_v22, %v1608_v21 }
 0x847   :  { %3925 = vmatprep.subr.mxu0 %v4309_v46 }
 0x848   :  { %v1074_v28 = vmul.f32 1.442695, %v1071_v27 }
 0x849   :  { %v1163_v30 = vpop.permute.xlu1 %1162 }
 0x84a   :  { %4208 = vpow2.f32 %v1074_v28  ;;  %3921 = vmatpush3.msra.mxu1 %v1163_v30 }
 0x84b   :  { %3930 = vmatprep.subr.mxu1 %v4309_v46 }
 0x84d   :  { %v1241_v37 = vpop.permute.xlu1 %1240 }
 0x850   :  { %v4207_v31 = vpop.eup %4206 }
 0x851   :  { %v1076_v32 = vsel %vm234_vm6, %v4207_v31, 0.0  ;;  %v1319_v41 = vpop.permute.xlu1 %1318 }
 0x852   :  { %1077 = vadd.xlane.f32.xlu0 %v1076_v32 }
 0x854   :  { %v4209_v33 = vpop.eup %4208 }
 0x855   :  { %v1079_v34 = vsel %vm234_vm6, %v4209_v33, 0.0  ;;  %v1317_v44 = vpop.permute.xlu1 %1316 }
 0x856   :  { %1080 = vadd.xlane.f32.xlu0 %v1079_v34 }
 0x86c   :  { %1238 = vrot.lane.b32.xlu0 %v4473_v51, %s4320_s25 }
 0x8df   :  { %v1078_v35 = vpop.xlane.xlu0 %1077 }
 0x8e0   :  { %4210 = vrcp.f32 %v1078_v35 }
 0x8e3   :  { %v1081_v36 = vpop.xlane.xlu0 %1080 }
 0x8e4   :  { %4212 = vrcp.f32 %v1081_v36 }
 0x8e7   :  { %v1239_v43 = vpop.permute.xlu0 %1238 }
 0x8ea   :  { %v4211_v38 = vpop.eup %4210 }
 0x8eb   :  { %v1084_v39 = vmul.f32 %v4211_v38, %v4207_v31 }
 0x8ed   :  { %3918 = vmatmul.mubr.msk.f32.vlgmr.msra.gmra.mrb[8].mxu0 %vm234_vm6, %v1084_v39 }
 0x8ee   :  { %v4213_v40 = vpop.eup %4212  ;;  %3926 = vmatpush3.xpose.msk.msra.mxu0 %vm234_vm6, %v1241_v37  ;;  %3927 = vmatprep.mubr.msk.f32.mxu0 %vm4310_vm5, %v4309_v46 }
 0x8ef   :  { %v1085_v42 = vmul.f32 %v4213_v40, %v4209_v33  ;;  %3935 = vmatprep.subr.mxu0 %v4309_v46 }
 0x8f1   :  { %3923 = vmatmul.mubr.msk.f32.vlgmr.msra.gmra.mrb[14].mxu1 %vm234_vm6, %v1085_v42  ;;  %3928 = vmatmul.mubr.msk.f32.vlgmr.msra.gmra.mrb[10].mxu0 %vm234_vm6, %v1239_v43  ;;  %v3700_v42 = vld [vmem:[%s5011_s7] ss:$0 sm:$0xff] }
 0x8f2   :  { %3931 = vmatpush3.xpose.msk.msra.mxu1 %vm234_vm6, %v1319_v41  ;;  %3932 = vmatprep.mubr.msk.f32.mxu1 %vm4310_vm5, %v4309_v46 }
 0x8f3   :  { %3940 = vmatprep.subr.mxu1 %v4309_v46  ;;  %3937 = vmatprep.mubr.msk.f32.mxu0 %vm4310_vm5, %v4309_v46 }
 0x8f5   :  { %3933 = vmatmul.mubr.msk.f32.vlgmr.msra.gmra.mrb[16].mxu1 %vm234_vm6, %v1317_v44 }
 0x8f6   :  { %3942 = vmatprep.mubr.msk.f32.mxu1 %vm4310_vm5, %v4309_v46 }
 0x9c0   :  { %v1158_v45 = vpop.f32.mrb[8].mxu0 }
 0x9c1   :  { %v3919_v47 = vpop.f32.mrb[9].mxu0 }
 0x9c4   :  { %v1234_v50 = vpop.f32.mrb[14].mxu1  ;;  %v1312_v52 = vpop.f32.mrb[10].mxu0 }
 0x9c5   :  { %v1394_v53 = vmul.f32 0.35355338, %v1312_v52  ;;  %v3924_v54 = vpop.f32.mrb[15].mxu1  ;;  %v3929_v55 = vpop.f32.mrb[11].mxu0 }
 0x9c7   :  { %v1398_v57 = vsel %vm1396_vm13, -1e+09, %v1394_v53 }
 0x9c8   :  { %v1390_v58 = vpop.f32.mrb[16].mxu1  ;;  %v1400_v59 = vsel %vm234_vm6, %v1398_v57, -inf }
 0x9c9   :  { %v1395_v60 = vmul.f32 0.35355338, %v1390_v58  ;;  %1401 = vmax.xlane.f32.xlu0 %v1400_v59  ;;  %v3934_v61 = vpop.f32.mrb[17].mxu1 }
 0x9ca   :  { %v1843_v61 = vld [vmem:[%s5014_s10 + $0x8] sm:$0xff] }
 0x9cb   :  { %v1399_v62 = vsel %vm1397_vm14, -1e+09, %v1395_v60  ;;  %v1842_v60 = vld [vmem:[%s5014_s10] sm:$0xff] }
 0x9cc   :  { %v1403_v63 = vsel %vm234_vm6, %v1399_v62, -inf }
 0x9cd   :  { %1404 = vmax.xlane.f32.xlu1 %v1403_v63  ;;  %v4123_v63 = vpack.c.bf16 %v1843_v61, %v1842_v60 }
 0x9de   :  { %1498 = vrot.lane.b32.xlu1 %v4471_v49, %s4321_s30 }
 0x9e2   :  { %1576 = vrot.lane.b32.xlu1 %v4571_v5, %s4322_s21 }
 0x9e6   :  { %1578 = vrot.lane.b32.xlu1 %v4576_v8, %s4322_s21 }
 0x9ea   :  { %1586 = vrot.lane.b32.xlu1 %v1234_v50, %s4323_s23 }
 0xa56   :  { %v1402_v2 = vpop.xlane.xlu0 %1401 }
 0xa57   :  { %v1406_v3 = vsub.f32 %v1398_v57, %v1402_v2  ;;  %v1751_v2 = vld [vmem:[%s5012_s8 + $0x8] sm:$0xff] }
 0xa59   :  { %v1408_v4 = vmul.f32 1.442695, %v1406_v3  ;;  %v1844_v3 = vld [vmem:[%s5014_s10 + $0x10] sm:$0xff] }
 0xa5a   :  { %v1405_v6 = vpop.xlane.xlu1 %1404 }
 0xa5b   :  { %4214 = vpow2.f32 %v1408_v4  ;;  %v1407_v7 = vsub.f32 %v1399_v62, %v1405_v6  ;;  %v1750_v62 = vld [vmem:[%s5012_s8] sm:$0xff]  ;;  %v1845_v4 = vld [vmem:[%s5014_s10 + $0x18] sm:$0xff] }
 0xa5c   :  { %v4115_v6 = vpack.c.bf16 %v1751_v2, %v1750_v62 }
 0xa5d   :  { %v1410_v9 = vmul.f32 1.442695, %v1407_v7  ;;  %v4127_v7 = vpack.c.bf16 %v1845_v4, %v1844_v3 }
 0xa5e   :  { %v1499_v10 = vpop.permute.xlu1 %1498 }
 0xa5f   :  { %4216 = vpow2.f32 %v1410_v9  ;;  %3941 = vmatpush3.msra.mxu1 %v1499_v10  ;;  %v78_v9 = vld [vmem:[%s5036_s18] sm:$0xff]  ;;  %v1752_v10 = vld [vmem:[%s5012_s8 + $0x10] sm:$0xff] }
 0xa60   :  { %4116 = vmatprep.subr.bf16.mxu1 %v4115_v6 }
 0xa62   :  { %v1577_v30 = vpop.permute.xlu1 %1576 }
 0xa63   :  { %v1598_v33 = vsel %vm234_vm6, %v4529_v26, %v1577_v30 }
 0xa65   :  { %v4215_v49 = vpop.eup %4214 }
 0xa66   :  { %v1412_v11 = vsel %vm234_vm6, %v4215_v49, 0.0  ;;  %v1579_v31 = vpop.permute.xlu1 %1578 }
 0xa67   :  { %1413 = vadd.xlane.f32.xlu0 %v1412_v11  ;;  %v1599_v38 = vsel %vm234_vm6, %v4534_v29, %v1579_v31 }
 0xa69   :  { %v4217_v5 = vpop.eup %4216 }
 0xa6a   :  { %v1415_v8 = vsel %vm234_vm6, %v4217_v5, 0.0  ;;  %v1587_v34 = vpop.permute.xlu1 %1586 }
 0xa6b   :  { %1416 = vadd.xlane.f32.xlu0 %v1415_v8  ;;  %v1602_v39 = vsel %vm1600_vm1, %v1599_v38, %v1587_v34  ;;  %v3706_v38 = vld [vmem:[%s5015_s11] ss:$0 sm:$0xff] }
 0xa81   :  { %1422 = vrot.lane.b32.xlu0 %v4473_v51, %s4321_s30  ;;  %v1606_v51 = vld [vmem:[%s5010_s6] sm:$0xff]  ;;  %s5028_s30 = smov 24   ;;  %s3702_s6 = sld [smem:[#allocation2 + $0x81]] }
 0xa82   :  { %v4107_v20 = vpack.c.bf16 %v1607_v19, %v1606_v51 }
 0xa85   :  { %1584 = vrot.lane.b32.xlu0 %v1158_v45, %s4323_s23 }
 0xa87   :  { %v1747_v31 = vstv %s3702_s6 }
 0xaf4   :  { %v1414_v12 = vpop.xlane.xlu0 %1413 }
 0xaf5   :  { %4218 = vrcp.f32 %v1414_v12 }
 0xaf8   :  { %v1417_v13 = vpop.xlane.xlu0 %1416 }
 0xaf9   :  { %4220 = vrcp.f32 %v1417_v13 }
 0xafc   :  { %v1423_v14 = vpop.permute.xlu0 %1422 }
 0xafd   :  { %3936 = vmatpush3.msra.mxu0 %v1423_v14 }
 0xafe   :  { %4108 = vmatprep.subr.bf16.mxu0 %v4107_v20 }
 0xaff   :  { %v4219_v15 = vpop.eup %4218 }
 0xb00   :  { %v1420_v16 = vmul.f32 %v4219_v15, %v4215_v49  ;;  %v1585_v32 = vpop.permute.xlu0 %1584  ;;  %v1753_v49 = vld [vmem:[%s5012_s8 + $0x18] sm:$0xff]  ;;  %s3701_s8 = sld [smem:[#allocation2 + $0x80]] }
 0xb01   :  { %v1601_v35 = vsel %vm1600_vm1, %v1598_v33, %v1585_v32  ;;  %v4119_v11 = vpack.c.bf16 %v1753_v49, %v1752_v10 }
 0xb02   :  { %3938 = vmatmul.mubr.msk.f32.vlgmr.msra.gmra.mrb[12].mxu0 %vm234_vm6, %v1420_v16 }
 0xb03   :  { %v4221_v17 = vpop.eup %4220  ;;  %4110 = vmatpush3.bf16.msra.mxu0 %v4107_v20 }
 0xb04   :  { %v1421_v18 = vmul.f32 %v4221_v17, %v4217_v5  ;;  %4112 = vmatprep.subr.bf16.mxu0 %v4111_v23  ;;  %v79_v5 = vld [vmem:[%s5036_s18 + $0x8] sm:$0xff]  ;;  %s5037_s18 = sld [smem:[#allocation11_spill]] }
 0xb06   :  { %3943 = vmatmul.mubr.msk.f32.vlgmr.msra.gmra.mrb[18].mxu1 %vm234_vm6, %v1421_v18 }
 0xb07   :  { %4114 = vmatpush3.bf16.msra.mxu0 %v4111_v23  ;;  %4118 = vmatpush3.bf16.msra.mxu1 %v4115_v6 }
 0xb08   :  { %4124 = vmatprep.subr.bf16.mxu0 %v4123_v63  ;;  %4120 = vmatprep.subr.bf16.mxu1 %v4119_v11 }
 0xb0b   :  { %4122 = vmatpush3.bf16.msra.mxu1 %v4119_v11 }
 0xb0c   :  { %3978 = vmatprep.subr.mxu1 %v4309_v46 }
 0xbd5   :  { %v1494_v24 = vpop.f32.mrb[12].mxu0 }
 0xbd6   :  { %1592 = vrot.lane.b32.xlu0 %v1494_v24, %s5028_s30  ;;  %v3939_v25 = vpop.f32.mrb[13].mxu0 }
 0xbd9   :  { %v1570_v27 = vpop.f32.mrb[18].mxu1 }
 0xbda   :  { %1594 = vrot.lane.b32.xlu1 %v1570_v27, %s5028_s30  ;;  %v3944_v28 = vpop.f32.mrb[19].mxu1  ;;  %v1737_v27 = vstv %s3701_s8 }
 0xc48   :  { %v1593_v36 = vpop.permute.xlu0 %1592 }
 0xc49   :  { %v1604_v37 = vsel %vm1603_vm15, %v1601_v35, %v1593_v36 }
 0xc4a   :  { %3953 = vmatprep.mubr.msk.f32.mxu0 %vm80_vm0, %v1604_v37 }
 0xc4c   :  { %v1595_v40 = vpop.permute.xlu1 %1594 }
 0xc4d   :  { %v1605_v41 = vsel %vm1603_vm15, %v1602_v39, %v1595_v40 }
 0xc4e   :  { %3954 = vmatmul.mubr.msk.f32.vlgmr.msra.gmra.mrb[14].mxu0 %vm80_vm0, %v1605_v41 }
 0xc4f   :  { %3975 = vmatprep.mubr.msk.f32.mxu0 %vm80_vm0, %v78_v9  ;;  %4126 = vmatpush3.bf16.msra.mxu0 %v4123_v63 }
 0xc50   :  { %4128 = vmatprep.subr.bf16.mxu0 %v4127_v7 }
 0xc53   :  { %4130 = vmatpush3.bf16.msra.mxu0 %v4127_v7 }
 0xc54   :  { %3988 = vmatprep.subr.mxu0 %v4309_v46 }
 0xc56   :  { %3976 = vmatmul.mubr.msk.f32.vlgmr.msra.gmra.mrb[16].mxu0 %vm80_vm0, %v79_v5 }
 0xc57   :  { %3990 = vmatprep.mubr.msk.f32.mxu0 %vm4310_vm5, %v4309_v46 }
 0xd21   :  { %v3955_v26 = vpop.f32.mrb[14].mxu0 }
 0xd22   :  { %v1692_v43 = vadd.f32 %v3955_v26, %v4438_v1  ;;  %v1682_v44 = vpop.f32.mrb[15].mxu0 }
 0xd23   :  { %v1691_v45 = vadd.f32 %v1682_v44, %v4433_v0 }
 0xd24   :  { %v4662_v47 = vadd.f32 %v3700_v42, %v1692_v43 }
 0xd25   :  { %v4664_v29 = vadd.f32 %v3700_v42, %v1691_v45  ;;  %v3703_v42 = vld [vmem:[%s5013_s9] ss:$0 sm:$0xff]  ;;  %s3737_s9 = sld [smem:[#allocation2 + $0x101]] }
 0xd26   :  { %v1705_v48 = vsel %vm80_vm0, %v4662_v47, 0.0 }
 0xd27   :  { %1706 = vadd.xlane.f32.xlu1 %v1705_v48  ;;  %v1702_v50 = vsel %vm80_vm0, %v4664_v29, 0.0 }
 0xd28   :  { %1703 = vadd.xlane.f32.xlu0 %v1702_v50  ;;  %v1934_v50 = vld [vmem:[%s5037_s18] sm:$0xff] }
 0xd29   :  { %v3977_v39 = vpop.f32.mrb[16].mxu0  ;;  %vm2096_vm8 = vcmp.eq.f32.partialorder %v1934_v50, 0.0 }
 0xd2a   :  { %v4722_v40 = vadd.f32 %v3977_v39, %v3706_v38  ;;  %v1925_v41 = vpop.f32.mrb[17].mxu0 }
 0xd2b   :  { %v4724_v26 = vadd.f32 %v3706_v38, %v1925_v41 }
 0xdb4   :  { %v1707_v52 = vpop.xlane.xlu1 %1706 }
 0xdb5   :  { %v1709_v53 = vmul.f32 0.03125, %v1707_v52  ;;  %v1704_v54 = vpop.xlane.xlu0 %1703 }
 0xdb6   :  { %v1708_v55 = vmul.f32 0.03125, %v1704_v54 }
 0xdb7   :  { %v4671_v1 = vsub.f32 %v4662_v47, %v1709_v53 }
 0xdb8   :  { %v1710_v0 = vsub.f32 %v4664_v29, %v1708_v55  ;;  %v1938_v55 = vld [vmem:[%s5037_s18 + $0x20] sm:$0xff] }
 0xdb9   :  { %v1713_v58 = vmul.f32 %v4671_v1, %v4671_v1  ;;  %v1739_v33 = vmul.f32 %v1737_v27, %v4671_v1  ;;  %vm2097_vm9 = vcmp.eq.f32.partialorder %v1938_v55, 0.0 }
 0xdba   :  { %v1712_v56 = vmul.f32 %v1710_v0, %v1710_v0  ;;  %v1738_v28 = vmul.f32 %v1737_v27, %v1710_v0 }
 0xdbb   :  { %v1717_v59 = vsel %vm80_vm0, %v1713_v58, 0.0 }
 0xdbc   :  { %v1714_v57 = vsel %vm80_vm0, %v1712_v56, 0.0 }
 0xdbd   :  { %1715 = vadd.xlane.f32.xlu0 %v1714_v57 }
 0xdc1   :  { %1718 = vadd.xlane.f32.xlu0 %v1717_v59 }
 0xe4a   :  { %v1716_v8 = vpop.xlane.xlu0 %1715 }
 0xe4b   :  { %v1720_v12 = vmul.f32 0.032258064, %v1716_v8 }
 0xe4d   :  { %4222 = vrsqrt.f32 %v1720_v12  ;;  %vm1724_vm2 = vcmp.eq.f32.partialorder %v1720_v12, inf  ;;  %v1727_v17 = vand.u32 2147483648, %v1720_v12  ;;  %vm1726_vm3 = vcmp.eq.f32.partialorder %v1720_v12, 0.0 }
 0xe4e   :  { %v1719_v13 = vpop.xlane.xlu0 %1718 }
 0xe4f   :  { %v1721_v14 = vmul.f32 0.032258064, %v1719_v13 }
 0xe51   :  { %4224 = vrsqrt.f32 %v1721_v14  ;;  %vm1731_vm4 = vcmp.eq.f32.partialorder %v1721_v14, inf  ;;  %v1734_v22 = vand.u32 2147483648, %v1721_v14  ;;  %vm1733_vm7 = vcmp.eq.f32.partialorder %v1721_v14, 0.0 }
 0xe57   :  { %v4223_v15 = vpop.eup %4222 }
 0xe58   :  { %v1723_v16 = vmul.f32 %v4223_v15, %v1720_v12 }
 0xe5a   :  { %v1725_v18 = vsel %vm1724_vm2, %v1720_v12, %v1723_v16 }
 0xe5b   :  { %v4225_v51 = vpop.eup %4224  ;;  %v1728_v19 = vsel %vm1726_vm3, %v1727_v17, %v1725_v18  ;;  %vm3558_vm3 = vcmask 523264  }
 0xe5c   :  { %v1730_v20 = vmul.f32 %v4225_v51, %v1721_v14  ;;  %v1740_v21 = vadd.f32 1e-06, %v1728_v19 }
 0xe5e   :  { %v1732_v23 = vsel %vm1731_vm4, %v1721_v14, %v1730_v20  ;;  %4226 = vrcp.f32 %v1740_v21  ;;  %v1935_v21 = vld [vmem:[%s5037_s18 + $0x8] sm:$0xff] }
 0xe5f   :  { %v1735_v24 = vsel %vm1733_vm7, %v1734_v22, %v1732_v23  ;;  %vm2432_vm10 = vcmp.eq.f32.partialorder %v1935_v21, 0.0 }
 0xe60   :  { %v1741_v25 = vadd.f32 1e-06, %v1735_v24 }
 0xe62   :  { %4228 = vrcp.f32 %v1741_v25 }
 0xe68   :  { %v4227_v30 = vpop.eup %4226 }
 0xe69   :  { %v1743_v32 = vmul.f32 %v4227_v30, %v1738_v28  ;;  %v1939_v28 = vld [vmem:[%s5037_s18 + $0x28] sm:$0xff] }
 0xe6a   :  { %vm2433_vm11 = vcmp.eq.f32.partialorder %v1939_v28, 0.0 }
 0xe6b   :  { %v1748_v34 = vadd.f32 %v1747_v31, %v1743_v32 }
 0xe6c   :  { %v4229_v35 = vpop.eup %4228 }
 0xe6d   :  { %v1745_v36 = vmul.f32 %v4229_v35, %v1739_v33  ;;  %3964 = vmatprep.mubr.msk.f32.mxu1 %vm80_vm0, %v1748_v34 }
 0xe6f   :  { %v1749_v37 = vadd.f32 %v1747_v31, %v1745_v36 }
 0xe71   :  { %3965 = vmatmul.mubr.msk.f32.vlgmr.msra.gmra.mrb[20].mxu1 %vm80_vm0, %v1749_v37 }
 0xe72   :  { %3980 = vmatprep.mubr.msk.f32.mxu1 %vm4310_vm5, %v4309_v46  ;;  %3979 = vmatpush3.xpose.msk.msra.mxu1 %vm234_vm6, %v4724_v26 }
 0xe73   :  { %3983 = vmatprep.subr.mxu1 %v4309_v46 }
 0xf44   :  { %v3966_v43 = vpop.f32.mrb[20].mxu1 }
 0xf45   :  { %v1833_v44 = vpop.f32.mrb[21].mxu1  ;;  %v4740_v48 = vadd.f32 %v3966_v43, %v3703_v42 }
 0xf46   :  { %v4732_v45 = vadd.f32 %v3703_v42, %v1833_v44 }
 0xf48   :  { %3981 = vmatmul.mubr.msk.f32.vlgmr.msra.gmra.mrb[22].mxu1 %vm234_vm6, %v4732_v45 }
 0xf49   :  { %3984 = vmatpush3.xpose.msk.msra.mxu1 %vm234_vm6, %v4722_v40  ;;  %3985 = vmatprep.mubr.msk.f32.mxu1 %vm4310_vm5, %v4309_v46 }
 0xf4a   :  { %3993 = vmatprep.subr.mxu1 %v4309_v46 }
 0xf4c   :  { %3986 = vmatmul.mubr.msk.f32.vlgmr.msra.gmra.mrb[24].mxu1 %vm234_vm6, %v4740_v48 }
 0xf4d   :  { %3995 = vmatprep.mubr.msk.f32.mxu1 %vm4310_vm5, %v4309_v46 }
0x101b   :  { %v2014_v52 = vpop.f32.mrb[22].mxu1 }
0x101c   :  { %v2094_v53 = vmul.f32 0.35355338, %v2014_v52  ;;  %v3982_v54 = vpop.f32.mrb[23].mxu1 }
0x101e   :  { %v2098_v1 = vsel %vm2096_vm8, -1e+09, %v2094_v53 }
0x101f   :  { %v2090_v0 = vpop.f32.mrb[24].mxu1  ;;  %v2100_v56 = vsel %vm234_vm6, %v2098_v1, -inf }
0x1020   :  { %v2095_v57 = vmul.f32 0.35355338, %v2090_v0  ;;  %2101 = vmax.xlane.f32.xlu0 %v2100_v56  ;;  %v3987_v58 = vpop.f32.mrb[25].mxu1 }
0x1022   :  { %v2099_v59 = vsel %vm2097_vm9, -1e+09, %v2095_v57 }
0x1023   :  { %v2103_v60 = vsel %vm234_vm6, %v2099_v59, -inf }
0x1024   :  { %2104 = vmax.xlane.f32.xlu1 %v2103_v60 }
0x1035   :  { %2198 = vrot.lane.b32.xlu1 %v4722_v40, %s4311_s22 }
0x1036   :  { %2122 = vrot.lane.b32.xlu0 %v4724_v26, %s4311_s22 }
0x1039   :  { %2276 = vrot.lane.b32.xlu1 %v4724_v26, %s4314_s26 }
0x103d   :  { %2354 = vrot.lane.b32.xlu1 %v4722_v40, %s4314_s26 }
0x10ad   :  { %v2102_v61 = vpop.xlane.xlu0 %2101 }
0x10ae   :  { %v2106_v62 = vsub.f32 %v2098_v1, %v2102_v61 }
0x10b0   :  { %v2108_v63 = vmul.f32 1.442695, %v2106_v62 }
0x10b1   :  { %v2123_v2 = vpop.permute.xlu0 %2122  ;;  %v2105_v3 = vpop.xlane.xlu1 %2104 }
0x10b2   :  { %4230 = vpow2.f32 %v2108_v63  ;;  %v2107_v4 = vsub.f32 %v2099_v59, %v2105_v3  ;;  %3989 = vmatpush3.msra.mxu0 %v2123_v2 }
0x10b3   :  { %3998 = vmatprep.subr.mxu0 %v4309_v46 }
0x10b4   :  { %v2110_v6 = vmul.f32 1.442695, %v2107_v4  ;;  %v1936_v4 = vld [vmem:[%s5037_s18 + $0x10] sm:$0xff] }
0x10b5   :  { %v2199_v7 = vpop.permute.xlu1 %2198  ;;  %vm2768_vm12 = vcmp.eq.f32.partialorder %v1936_v4, 0.0 }
0x10b6   :  { %4232 = vpow2.f32 %v2110_v6  ;;  %3994 = vmatpush3.msra.mxu1 %v2199_v7 }
0x10b7   :  { %4003 = vmatprep.subr.mxu1 %v4309_v46 }
0x10b9   :  { %v2277_v5 = vpop.permute.xlu1 %2276 }
0x10bc   :  { %v4231_v9 = vpop.eup %4230 }
0x10bd   :  { %v2112_v10 = vsel %vm234_vm6, %v4231_v9, 0.0  ;;  %v2355_v8 = vpop.permute.xlu1 %2354 }
0x10be   :  { %2113 = vadd.xlane.f32.xlu0 %v2112_v10 }
0x10c0   :  { %v4233_v49 = vpop.eup %4232 }
0x10c1   :  { %v2115_v11 = vsel %vm234_vm6, %v4233_v49, 0.0 }
0x10c2   :  { %2116 = vadd.xlane.f32.xlu1 %v2115_v11  ;;  %v1940_v11 = vld [vmem:[%s5037_s18 + $0x30] sm:$0xff] }
0x10c3   :  { %vm2769_vm13 = vcmp.eq.f32.partialorder %v1940_v11, 0.0 }
0x10d3   :  { %2352 = vrot.lane.b32.xlu1 %v4740_v48, %s4314_s26 }
0x10d4   :  { %2274 = vrot.lane.b32.xlu0 %v4732_v45, %s4314_s26 }
0x114b   :  { %v2114_v12 = vpop.xlane.xlu0 %2113 }
0x114c   :  { %4234 = vrcp.f32 %v2114_v12 }
0x114f   :  { %v2117_v13 = vpop.xlane.xlu1 %2116  ;;  %v2275_v18 = vpop.permute.xlu0 %2274 }
0x1150   :  { %4236 = vrcp.f32 %v2117_v13 }
0x1153   :  { %v2353_v51 = vpop.permute.xlu1 %2352 }
0x1156   :  { %v4235_v14 = vpop.eup %4234 }
0x1157   :  { %v2120_v15 = vmul.f32 %v4235_v14, %v4231_v9 }
0x1159   :  { %3991 = vmatmul.mubr.msk.f32.vlgmr.msra.gmra.mrb[18].mxu0 %vm234_vm6, %v2120_v15 }
0x115a   :  { %v4237_v16 = vpop.eup %4236  ;;  %3999 = vmatpush3.xpose.msk.msra.mxu0 %vm234_vm6, %v2277_v5  ;;  %4000 = vmatprep.mubr.msk.f32.mxu0 %vm4310_vm5, %v4309_v46 }
0x115b   :  { %v2121_v17 = vmul.f32 %v4237_v16, %v4233_v49  ;;  %4008 = vmatprep.subr.mxu0 %v4309_v46 }
0x115d   :  { %3996 = vmatmul.mubr.msk.f32.vlgmr.msra.gmra.mrb[26].mxu1 %vm234_vm6, %v2121_v17  ;;  %4001 = vmatmul.mubr.msk.f32.vlgmr.msra.gmra.mrb[20].mxu0 %vm234_vm6, %v2275_v18 }
0x115e   :  { %4004 = vmatpush3.xpose.msk.msra.mxu1 %vm234_vm6, %v2355_v8  ;;  %4005 = vmatprep.mubr.msk.f32.mxu1 %vm4310_vm5, %v4309_v46 }
0x115f   :  { %4013 = vmatprep.subr.mxu1 %v4309_v46  ;;  %4010 = vmatprep.mubr.msk.f32.mxu0 %vm4310_vm5, %v4309_v46 }
0x1161   :  { %4006 = vmatmul.mubr.msk.f32.vlgmr.msra.gmra.mrb[28].mxu1 %vm234_vm6, %v2353_v51 }
0x1162   :  { %4015 = vmatprep.mubr.msk.f32.mxu1 %vm4310_vm5, %v4309_v46 }
0x122c   :  { %v4787_v19 = vpop.f32.mrb[18].mxu0 }
0x122d   :  { %v3992_v20 = vpop.f32.mrb[19].mxu0 }
0x1230   :  { %v4792_v22 = vpop.f32.mrb[26].mxu1  ;;  %v2348_v23 = vpop.f32.mrb[20].mxu0 }
0x1231   :  { %v2430_v24 = vmul.f32 0.35355338, %v2348_v23  ;;  %v3997_v25 = vpop.f32.mrb[27].mxu1  ;;  %v4002_v27 = vpop.f32.mrb[21].mxu0 }
0x1233   :  { %v2434_v30 = vsel %vm2432_vm10, -1e+09, %v2430_v24 }
0x1234   :  { %v2426_v31 = vpop.f32.mrb[28].mxu1  ;;  %v2436_v32 = vsel %vm234_vm6, %v2434_v30, -inf }
0x1235   :  { %v2431_v33 = vmul.f32 0.35355338, %v2426_v31  ;;  %2437 = vmax.xlane.f32.xlu0 %v2436_v32  ;;  %v4007_v34 = vpop.f32.mrb[29].mxu1 }
0x1237   :  { %v2435_v35 = vsel %vm2433_vm11, -1e+09, %v2431_v33 }
0x1238   :  { %v2439_v36 = vsel %vm234_vm6, %v2435_v35, -inf }
0x1239   :  { %2440 = vmax.xlane.f32.xlu1 %v2439_v36 }
0x124a   :  { %2534 = vrot.lane.b32.xlu1 %v4722_v40, %s4313_s3 }
0x124b   :  { %2458 = vrot.lane.b32.xlu0 %v4724_v26, %s4313_s3 }
0x124e   :  { %2612 = vrot.lane.b32.xlu1 %v4724_v26, %s4317_s20 }
0x1252   :  { %2690 = vrot.lane.b32.xlu1 %v4722_v40, %s4317_s20 }
0x1256   :  { %2688 = vrot.lane.b32.xlu1 %v4740_v48, %s4317_s20 }
0x12c2   :  { %v2438_v37 = vpop.xlane.xlu0 %2437 }
0x12c3   :  { %v2442_v38 = vsub.f32 %v2434_v30, %v2438_v37 }
0x12c5   :  { %v2444_v39 = vmul.f32 1.442695, %v2442_v38 }
0x12c6   :  { %v2459_v41 = vpop.permute.xlu0 %2458  ;;  %v2441_v42 = vpop.xlane.xlu1 %2440 }
0x12c7   :  { %4238 = vpow2.f32 %v2444_v39  ;;  %v2443_v43 = vsub.f32 %v2435_v35, %v2441_v42  ;;  %4009 = vmatpush3.msra.mxu0 %v2459_v41 }
0x12c8   :  { %4018 = vmatprep.subr.mxu0 %v4309_v46 }
0x12c9   :  { %v2446_v44 = vmul.f32 1.442695, %v2443_v43  ;;  %v1937_v43 = vld [vmem:[%s5037_s18 + $0x18] sm:$0xff] }
0x12ca   :  { %v2535_v50 = vpop.permute.xlu1 %2534  ;;  %vm3104_vm14 = vcmp.eq.f32.partialorder %v1937_v43, 0.0 }
0x12cb   :  { %4240 = vpow2.f32 %v2446_v44  ;;  %4014 = vmatpush3.msra.mxu1 %v2535_v50 }
0x12cc   :  { %4023 = vmatprep.subr.mxu1 %v4309_v46 }
0x12ce   :  { %v2613_v56 = vpop.permute.xlu1 %2612 }
0x12d1   :  { %v4239_v52 = vpop.eup %4238 }
0x12d2   :  { %v2448_v53 = vsel %vm234_vm6, %v4239_v52, 0.0  ;;  %v2691_v60 = vpop.permute.xlu1 %2690 }
0x12d3   :  { %2449 = vadd.xlane.f32.xlu0 %v2448_v53 }
0x12d5   :  { %v4241_v54 = vpop.eup %4240 }
0x12d6   :  { %v2451_v55 = vsel %vm234_vm6, %v4241_v54, 0.0  ;;  %v2689_v63 = vpop.permute.xlu1 %2688 }
0x12d7   :  { %2452 = vadd.xlane.f32.xlu0 %v2451_v55  ;;  %v1941_v55 = vld [vmem:[%s5037_s18 + $0x38] sm:$0xff]  ;;  %s5038_s18 = smov 24  }
0x12ed   :  { %2610 = vrot.lane.b32.xlu0 %v4732_v45, %s4317_s20 }
0x1360   :  { %v2450_v1 = vpop.xlane.xlu0 %2449 }
0x1361   :  { %4242 = vrcp.f32 %v2450_v1 }
0x1364   :  { %v2453_v0 = vpop.xlane.xlu0 %2452 }
0x1365   :  { %4244 = vrcp.f32 %v2453_v0 }
0x1368   :  { %v2611_v62 = vpop.permute.xlu0 %2610 }
0x136b   :  { %v4243_v57 = vpop.eup %4242 }
0x136c   :  { %v2456_v58 = vmul.f32 %v4243_v57, %v4239_v52 }
0x136e   :  { %4011 = vmatmul.mubr.msk.f32.vlgmr.msra.gmra.mrb[22].mxu0 %vm234_vm6, %v2456_v58 }
0x136f   :  { %v4245_v59 = vpop.eup %4244  ;;  %4019 = vmatpush3.xpose.msk.msra.mxu0 %vm234_vm6, %v2613_v56  ;;  %4020 = vmatprep.mubr.msk.f32.mxu0 %vm4310_vm5, %v4309_v46 }
0x1370   :  { %v2457_v61 = vmul.f32 %v4245_v59, %v4241_v54  ;;  %4028 = vmatprep.subr.mxu0 %v4309_v46 }
0x1372   :  { %4016 = vmatmul.mubr.msk.f32.vlgmr.msra.gmra.mrb[30].mxu1 %vm234_vm6, %v2457_v61  ;;  %4021 = vmatmul.mubr.msk.f32.vlgmr.msra.gmra.mrb[24].mxu0 %vm234_vm6, %v2611_v62 }
0x1373   :  { %4024 = vmatpush3.xpose.msk.msra.mxu1 %vm234_vm6, %v2691_v60  ;;  %4025 = vmatprep.mubr.msk.f32.mxu1 %vm4310_vm5, %v4309_v46 }
0x1374   :  { %4033 = vmatprep.subr.mxu1 %v4309_v46  ;;  %4030 = vmatprep.mubr.msk.f32.mxu0 %vm4310_vm5, %v4309_v46 }
0x1376   :  { %4026 = vmatmul.mubr.msk.f32.vlgmr.msra.gmra.mrb[32].mxu1 %vm234_vm6, %v2689_v63 }
0x1377   :  { %4035 = vmatprep.mubr.msk.f32.mxu1 %vm4310_vm5, %v4309_v46 }
0x1441   :  { %v4831_v2 = vpop.f32.mrb[22].mxu0 }
0x1442   :  { %v4012_v3 = vpop.f32.mrb[23].mxu0 }
0x1445   :  { %v4836_v6 = vpop.f32.mrb[30].mxu1  ;;  %v2684_v7 = vpop.f32.mrb[24].mxu0 }
0x1446   :  { %v2766_v9 = vmul.f32 0.35355338, %v2684_v7  ;;  %v4017_v10 = vpop.f32.mrb[31].mxu1  ;;  %v4022_v49 = vpop.f32.mrb[25].mxu0 }
0x1448   :  { %v2770_v5 = vsel %vm2768_vm12, -1e+09, %v2766_v9 }
0x1449   :  { %v2762_v8 = vpop.f32.mrb[32].mxu1  ;;  %v2772_v12 = vsel %vm234_vm6, %v2770_v5, -inf }
0x144a   :  { %v2767_v13 = vmul.f32 0.35355338, %v2762_v8  ;;  %2773 = vmax.xlane.f32.xlu0 %v2772_v12  ;;  %v4027_v14 = vpop.f32.mrb[33].mxu1 }
0x144b   :  { %v3313_v14 = vld [vmem:[%s5016_s12 + $0x8] sm:$0xff] }
0x144c   :  { %v2771_v15 = vsel %vm2769_vm13, -1e+09, %v2767_v13 }
0x144d   :  { %v2775_v16 = vsel %vm234_vm6, %v2771_v15, -inf }
0x144e   :  { %2776 = vmax.xlane.f32.xlu1 %v2775_v16  ;;  %v3314_v16 = vld [vmem:[%s5016_s12 + $0x10] sm:$0xff] }
0x145f   :  { %2870 = vrot.lane.b32.xlu1 %v4722_v40, %s4316_s4 }
0x1460   :  { %2794 = vrot.lane.b32.xlu0 %v4724_v26, %s4316_s4 }
0x1463   :  { %2948 = vrot.lane.b32.xlu1 %v4724_v26, %s4320_s25 }
0x1467   :  { %3026 = vrot.lane.b32.xlu1 %v4722_v40, %s4320_s25 }
0x146b   :  { %3024 = vrot.lane.b32.xlu1 %v4740_v48, %s4320_s25 }
0x14d7   :  { %v2774_v17 = vpop.xlane.xlu0 %2773 }
0x14d8   :  { %v2778_v18 = vsub.f32 %v2770_v5, %v2774_v17  ;;  %v3315_v17 = vld [vmem:[%s5016_s12 + $0x18] sm:$0xff] }
0x14da   :  { %v2780_v51 = vmul.f32 1.442695, %v2778_v18  ;;  %v4135_v18 = vpack.c.bf16 %v3315_v17, %v3314_v16 }
0x14db   :  { %v2795_v20 = vpop.permute.xlu0 %2794  ;;  %v2777_v21 = vpop.xlane.xlu1 %2776 }
0x14dc   :  { %4246 = vpow2.f32 %v2780_v51  ;;  %v2779_v23 = vsub.f32 %v2771_v15, %v2777_v21  ;;  %4029 = vmatpush3.msra.mxu0 %v2795_v20 }
0x14dd   :  { %4038 = vmatprep.subr.mxu0 %v4309_v46 }
0x14de   :  { %v2782_v24 = vmul.f32 1.442695, %v2779_v23 }
0x14df   :  { %v2871_v25 = vpop.permute.xlu1 %2870 }
0x14e0   :  { %4248 = vpow2.f32 %v2782_v24  ;;  %4034 = vmatpush3.msra.mxu1 %v2871_v25 }
0x14e1   :  { %4043 = vmatprep.subr.mxu1 %v4309_v46 }
0x14e3   :  { %v2949_v33 = vpop.permute.xlu1 %2948 }
0x14e6   :  { %v4247_v27 = vpop.eup %4246 }
0x14e7   :  { %v2784_v28 = vsel %vm234_vm6, %v4247_v27, 0.0  ;;  %v3027_v37 = vpop.permute.xlu1 %3026 }
0x14e8   :  { %2785 = vadd.xlane.f32.xlu0 %v2784_v28 }
0x14ea   :  { %v4249_v48 = vpop.eup %4248 }
0x14eb   :  { %v2787_v30 = vsel %vm234_vm6, %v4249_v48, 0.0  ;;  %v3025_v39 = vpop.permute.xlu1 %3024 }
0x14ec   :  { %2788 = vadd.xlane.f32.xlu0 %v2787_v30 }
0x1502   :  { %2946 = vrot.lane.b32.xlu0 %v4732_v45, %s4320_s25 }
0x1575   :  { %v2786_v31 = vpop.xlane.xlu0 %2785 }
0x1576   :  { %4250 = vrcp.f32 %v2786_v31 }
0x1579   :  { %v2789_v32 = vpop.xlane.xlu0 %2788 }
0x157a   :  { %4252 = vrcp.f32 %v2789_v32 }
0x157d   :  { %v2947_v45 = vpop.permute.xlu0 %2946 }
0x1580   :  { %v4251_v34 = vpop.eup %4250 }
0x1581   :  { %v2792_v35 = vmul.f32 %v4251_v34, %v4247_v27 }
0x1583   :  { %4031 = vmatmul.mubr.msk.f32.vlgmr.msra.gmra.mrb[26].mxu0 %vm234_vm6, %v2792_v35 }
0x1584   :  { %v4253_v36 = vpop.eup %4252  ;;  %4039 = vmatpush3.xpose.msk.msra.mxu0 %vm234_vm6, %v2949_v33  ;;  %4040 = vmatprep.mubr.msk.f32.mxu0 %vm4310_vm5, %v4309_v46 }
0x1585   :  { %v2793_v38 = vmul.f32 %v4253_v36, %v4249_v48  ;;  %4048 = vmatprep.subr.mxu0 %v4309_v46 }
0x1587   :  { %4036 = vmatmul.mubr.msk.f32.vlgmr.msra.gmra.mrb[34].mxu1 %vm234_vm6, %v2793_v38  ;;  %4041 = vmatmul.mubr.msk.f32.vlgmr.msra.gmra.mrb[28].mxu0 %vm234_vm6, %v2947_v45 }
0x1588   :  { %4044 = vmatpush3.xpose.msk.msra.mxu1 %vm234_vm6, %v3027_v37  ;;  %4045 = vmatprep.mubr.msk.f32.mxu1 %vm4310_vm5, %v4309_v46 }
0x1589   :  { %4053 = vmatprep.subr.mxu1 %v4309_v46  ;;  %4050 = vmatprep.mubr.msk.f32.mxu0 %vm4310_vm5, %v4309_v46 }
0x158b   :  { %4046 = vmatmul.mubr.msk.f32.vlgmr.msra.gmra.mrb[36].mxu1 %vm234_vm6, %v3025_v39 }
0x158c   :  { %4055 = vmatprep.mubr.msk.f32.mxu1 %vm4310_vm5, %v4309_v46  ;;  %vm3105_vm5 = vcmp.eq.f32.partialorder %v1941_v55, 0.0 }
0x1656   :  { %v2866_v41 = vpop.f32.mrb[26].mxu0 }
0x1657   :  { %v4032_v42 = vpop.f32.mrb[27].mxu0 }
0x165a   :  { %v2942_v44 = vpop.f32.mrb[34].mxu1  ;;  %v3020_v50 = vpop.f32.mrb[28].mxu0 }
0x165b   :  { %v3102_v52 = vmul.f32 0.35355338, %v3020_v50  ;;  %v4037_v53 = vpop.f32.mrb[35].mxu1  ;;  %v4042_v54 = vpop.f32.mrb[29].mxu0 }
0x165d   :  { %v3106_v1 = vsel %vm3104_vm14, -1e+09, %v3102_v52 }
0x165e   :  { %v3098_v0 = vpop.f32.mrb[36].mxu1  ;;  %v3108_v46 = vsel %vm234_vm6, %v3106_v1, -inf }
0x165f   :  { %v3103_v56 = vmul.f32 0.35355338, %v3098_v0  ;;  %3109 = vmax.xlane.f32.xlu0 %v3108_v46  ;;  %v4047_v57 = vpop.f32.mrb[37].mxu1  ;;  %v3456_v46 = vld [vmem:[%s5018_s14] sm:$0xff] }
0x1660   :  { %v3458_v57 = vld [vmem:[%s5018_s14 + $0x10] sm:$0xff] }
0x1661   :  { %v3107_v58 = vsel %vm3105_vm5, -1e+09, %v3103_v56  ;;  %v3457_v56 = vld [vmem:[%s5018_s14 + $0x8] sm:$0xff] }
0x1662   :  { %v3111_v59 = vsel %vm234_vm6, %v3107_v58, -inf }
0x1663   :  { %3112 = vmax.xlane.f32.xlu1 %v3111_v59  ;;  %v3459_v59 = vld [vmem:[%s5018_s14 + $0x18] sm:$0xff] }
0x1674   :  { %3206 = vrot.lane.b32.xlu1 %v4722_v40, %s4319_s24 }
0x1678   :  { %3284 = vrot.lane.b32.xlu1 %v4831_v2, %s4322_s21 }
0x167c   :  { %3286 = vrot.lane.b32.xlu1 %v4836_v6, %s4322_s21 }
0x1680   :  { %3294 = vrot.lane.b32.xlu1 %v2942_v44, %s4323_s23 }
0x16ec   :  { %v3110_v60 = vpop.xlane.xlu0 %3109 }
0x16ed   :  { %v3114_v61 = vsub.f32 %v3106_v1, %v3110_v60  ;;  %v4143_v60 = vpack.c.bf16 %v3459_v59, %v3458_v57 }
0x16ef   :  { %v3116_v62 = vmul.f32 1.442695, %v3114_v61  ;;  %v3550_v61 = vld [vmem:[%s5020_s16] sm:$0xff] }
0x16f0   :  { %v3113_v63 = vpop.xlane.xlu1 %3112 }
0x16f1   :  { %4254 = vpow2.f32 %v3116_v62  ;;  %v3115_v3 = vsub.f32 %v3107_v58, %v3113_v63  ;;  %v4139_v58 = vpack.c.bf16 %v3457_v56, %v3456_v46  ;;  %v3551_v62 = vld [vmem:[%s5020_s16 + $0x8] sm:$0xff]  ;;  %v3552_v63 = vld [vmem:[%s5020_s16 + $0x10] sm:$0xff] }
0x16f3   :  { %v3118_v4 = vmul.f32 1.442695, %v3115_v3  ;;  %v4147_v3 = vpack.c.bf16 %v3551_v62, %v3550_v61 }
0x16f4   :  { %v3207_v7 = vpop.permute.xlu1 %3206 }
0x16f5   :  { %4256 = vpow2.f32 %v3118_v4  ;;  %4054 = vmatpush3.msra.mxu1 %v3207_v7  ;;  %v3553_v4 = vld [vmem:[%s5020_s16 + $0x18] sm:$0xff] }
0x16f6   :  { %4140 = vmatprep.subr.bf16.mxu1 %v4139_v58  ;;  %v4151_v7 = vpack.c.bf16 %v3553_v4, %v3552_v63 }
0x16f8   :  { %v3285_v24 = vpop.permute.xlu1 %3284 }
0x16f9   :  { %v3306_v28 = vsel %vm234_vm6, %v4787_v19, %v3285_v24  ;;  %v3735_v19 = vld [vmem:[%s5017_s13] ss:$0 sm:$0xff] }
0x16fb   :  { %v4255_v9 = vpop.eup %4254 }
0x16fc   :  { %v3120_v40 = vsel %vm234_vm6, %v4255_v9, 0.0  ;;  %v3287_v25 = vpop.permute.xlu1 %3286 }
0x16fd   :  { %3121 = vadd.xlane.f32.xlu0 %v3120_v40  ;;  %v3307_v33 = vsel %vm234_vm6, %v4792_v22, %v3287_v25  ;;  %v3555_v40 = vld [vmem:[%s5020_s16 + $0x28] sm:$0xff]  ;;  %v3453_v25 = vstv %s3737_s9 }
0x16ff   :  { %v4257_v2 = vpop.eup %4256 }
0x1700   :  { %v3123_v10 = vsel %vm234_vm6, %v4257_v2, 0.0  ;;  %v3295_v48 = vpop.permute.xlu1 %3294 }
0x1701   :  { %3124 = vadd.xlane.f32.xlu0 %v3123_v10  ;;  %v3309_v34 = vsel %vm1600_vm1, %v3307_v33, %v3295_v48  ;;  %v3556_v33 = vld [vmem:[%s5020_s16 + $0x30] sm:$0xff] }
0x1717   :  { %3130 = vrot.lane.b32.xlu0 %v4724_v26, %s4319_s24  ;;  %v3312_v26 = vld [vmem:[%s5016_s12] sm:$0xff] }
0x1718   :  { %v4131_v15 = vpack.c.bf16 %v3313_v14, %v3312_v26 }
0x171b   :  { %3292 = vrot.lane.b32.xlu0 %v2866_v41, %s4323_s23 }
0x178a   :  { %v3122_v6 = vpop.xlane.xlu0 %3121 }
0x178b   :  { %4258 = vrcp.f32 %v3122_v6 }
0x178e   :  { %v3125_v49 = vpop.xlane.xlu0 %3124 }
0x178f   :  { %4260 = vrcp.f32 %v3125_v49 }
0x1792   :  { %v3131_v11 = vpop.permute.xlu0 %3130 }
0x1793   :  { %4049 = vmatpush3.msra.mxu0 %v3131_v11 }
0x1794   :  { %4132 = vmatprep.subr.bf16.mxu0 %v4131_v15 }
0x1795   :  { %v4259_v5 = vpop.eup %4258 }
0x1796   :  { %v3128_v8 = vmul.f32 %v4259_v5, %v4255_v9  ;;  %v3293_v27 = vpop.permute.xlu0 %3292  ;;  %v3554_v9 = vld [vmem:[%s5020_s16 + $0x20] sm:$0xff] }
0x1797   :  { %v3308_v30 = vsel %vm1600_vm1, %v3306_v28, %v3293_v27 }
0x1798   :  { %4051 = vmatmul.mubr.msk.f32.vlgmr.msra.gmra.mrb[30].mxu0 %vm234_vm6, %v3128_v8 }
0x1799   :  { %v4261_v12 = vpop.eup %4260  ;;  %4134 = vmatpush3.bf16.msra.mxu0 %v4131_v15 }
0x179a   :  { %v3129_v13 = vmul.f32 %v4261_v12, %v4257_v2  ;;  %4136 = vmatprep.subr.bf16.mxu0 %v4135_v18  ;;  %v4155_v2 = vpack.c.bf16 %v3555_v40, %v3554_v9 }
0x179c   :  { %4056 = vmatmul.mubr.msk.f32.vlgmr.msra.gmra.mrb[38].mxu1 %vm234_vm6, %v3129_v13 }
0x179d   :  { %4138 = vmatpush3.bf16.msra.mxu0 %v4135_v18  ;;  %4142 = vmatpush3.bf16.msra.mxu1 %v4139_v58 }
0x179e   :  { %4144 = vmatprep.subr.bf16.mxu1 %v4143_v60  ;;  %4148 = vmatprep.subr.bf16.mxu0 %v4147_v3 }
0x17a1   :  { %4146 = vmatpush3.bf16.msra.mxu1 %v4143_v60 }
0x186b   :  { %v3202_v51 = vpop.f32.mrb[30].mxu0 }
0x186c   :  { %3300 = vrot.lane.b32.xlu0 %v3202_v51, %s5038_s18  ;;  %v4052_v20 = vpop.f32.mrb[31].mxu0 }
0x186f   :  { %v3278_v21 = vpop.f32.mrb[38].mxu1 }
0x1870   :  { %3302 = vrot.lane.b32.xlu1 %v3278_v21, %s5038_s18  ;;  %v4057_v23 = vpop.f32.mrb[39].mxu1  ;;  %v3443_v21 = vstv %s3736_s2 }
0x18de   :  { %v3301_v31 = vpop.permute.xlu0 %3300 }
0x18df   :  { %v3310_v32 = vsel %vm1603_vm15, %v3308_v30, %v3301_v31 }
0x18e0   :  { %4066 = vmatprep.mubr.msk.f32.mxu0 %vm80_vm0, %v3310_v32 }
0x18e2   :  { %v3303_v35 = vpop.permute.xlu1 %3302 }
0x18e3   :  { %v3311_v36 = vsel %vm1603_vm15, %v3309_v34, %v3303_v35  ;;  %v3557_v34 = vld [vmem:[%s5020_s16 + $0x38] sm:$0xff]  ;;  %s4325_s16 = smov [#allocation5]  }
0x18e4   :  { %4067 = vmatmul.mubr.msk.f32.vlgmr.msra.gmra.mrb[32].mxu0 %vm80_vm0, %v3311_v36  ;;  %v4159_v35 = vpack.c.bf16 %v3557_v34, %v3556_v33  ;;  %v3738_v36 = vld [vmem:[%s5019_s15] ss:$0 sm:$0xff]  ;;  %s3658_s29 = sshll.u32 %s4325_s16, 4  ;;  %s3659_s29 = int_to_ptr.vmem [resolvable:$true] %s3658_s29 }
0x18e5   :  { %4150 = vmatpush3.bf16.msra.mxu0 %v4147_v3  ;;  %s4282_s15 = scalar_lea.vmem %s3659_s29, 256  ;;  %p4287_p6 = scmp.lt.s32.totalorder %s3659_s29, %s3659_s29 }
0x18e6   :  { %4152 = vmatprep.subr.bf16.mxu0 %v4151_v7  ;;  %p4283_p5 = scmp.ne.s32.totalorder %s3659_s29, %s4282_s15  ;;  %p4288_p7 = scmp.lt.s32.totalorder %s4282_s15, %s4282_s15 }
0x18e8   :  { %p4289_p8 = por %p4288_p7, %p4287_p6 }
0x18e9   :  { %4154 = vmatpush3.bf16.msra.mxu0 %v4151_v7 }
0x18ea   :  { %4156 = vmatprep.subr.bf16.mxu0 %v4155_v2  ;;  %p4290_p9 = pnand %p4289_p8, %p4283_p5 }
0x18ed   :  { %4158 = vmatpush3.bf16.msra.mxu0 %v4155_v2 }
0x18ee   :  { %4160 = vmatprep.subr.bf16.mxu0 %v4159_v35 }
0x18f1   :  { %4162 = vmatpush3.bf16.msra.mxu0 %v4159_v35 }
0x19b7   :  { %v4068_v37 = vpop.f32.mrb[32].mxu0 }
0x19b8   :  { %v3398_v38 = vadd.f32 %v4068_v37, %v4662_v47  ;;  %v3388_v45 = vpop.f32.mrb[33].mxu0 }
0x19b9   :  { %v3397_v39 = vadd.f32 %v3388_v45, %v4664_v29 }
0x19ba   :  { %v4926_v41 = vadd.f32 %v3735_v19, %v3398_v38 }
0x19bb   :  { %v4928_v22 = vadd.f32 %v3735_v19, %v3397_v39 }
0x19bc   :  { %v3411_v42 = vsel %vm80_vm0, %v4926_v41, 0.0 }
0x19bd   :  { %3412 = vadd.xlane.f32.xlu1 %v3411_v42  ;;  %v3408_v43 = vsel %vm80_vm0, %v4928_v22, 0.0 }
0x19be   :  { %3409 = vadd.xlane.f32.xlu0 %v3408_v43 }
0x1a4a   :  { %v3413_v44 = vpop.xlane.xlu1 %3412 }
0x1a4b   :  { %v3415_v50 = vmul.f32 0.03125, %v3413_v44  ;;  %v3410_v52 = vpop.xlane.xlu0 %3409  ;;  %v3743_v44 = vld [vmem:[%s5021_s17] ss:$0 sm:$0xff] }
0x1a4c   :  { %v3414_v53 = vmul.f32 0.03125, %v3410_v52 }
0x1a4d   :  { %v4935_v47 = vsub.f32 %v4926_v41, %v3415_v50 }
0x1a4e   :  { %v3416_v29 = vsub.f32 %v4928_v22, %v3414_v53 }
0x1a4f   :  { %v3419_v1 = vmul.f32 %v4935_v47, %v4935_v47  ;;  %v3445_v28 = vmul.f32 %v3443_v21, %v4935_v47 }
0x1a50   :  { %v3418_v54 = vmul.f32 %v3416_v29, %v3416_v29  ;;  %v3444_v23 = vmul.f32 %v3443_v21, %v3416_v29 }
0x1a51   :  { %v3423_v0 = vsel %vm80_vm0, %v3419_v1, 0.0 }
0x1a52   :  { %v3420_v55 = vsel %vm80_vm0, %v3418_v54, 0.0 }
0x1a53   :  { %3421 = vadd.xlane.f32.xlu0 %v3420_v55 }
0x1a57   :  { %3424 = vadd.xlane.f32.xlu0 %v3423_v0 }
0x1ae0   :  { %v3422_v10 = vpop.xlane.xlu0 %3421 }
0x1ae1   :  { %v3426_v6 = vmul.f32 0.032258064, %v3422_v10 }
0x1ae3   :  { %4262 = vrsqrt.f32 %v3426_v6  ;;  %vm3430_vm6 = vcmp.eq.f32.partialorder %v3426_v6, inf  ;;  %v3433_v12 = vand.u32 2147483648, %v3426_v6  ;;  %vm3432_vm15 = vcmp.eq.f32.partialorder %v3426_v6, 0.0 }
0x1ae4   :  { %v3425_v49 = vpop.xlane.xlu0 %3424 }
0x1ae5   :  { %v3427_v11 = vmul.f32 0.032258064, %v3425_v49 }
0x1ae7   :  { %4264 = vrsqrt.f32 %v3427_v11  ;;  %vm3437_vm1 = vcmp.eq.f32.partialorder %v3427_v11, inf  ;;  %v3440_v17 = vand.u32 2147483648, %v3427_v11  ;;  %vm3439_vm2 = vcmp.eq.f32.partialorder %v3427_v11, 0.0 }
0x1aed   :  { %v4263_v5 = vpop.eup %4262 }
0x1aee   :  { %v3429_v8 = vmul.f32 %v4263_v5, %v3426_v6 }
0x1af0   :  { %v3431_v13 = vsel %vm3430_vm6, %v3426_v6, %v3429_v8 }
0x1af1   :  { %v4265_v26 = vpop.eup %4264  ;;  %v3434_v14 = vsel %vm3432_vm15, %v3433_v12, %v3431_v13 }
0x1af2   :  { %v3436_v15 = vmul.f32 %v4265_v26, %v3427_v11  ;;  %v3446_v16 = vadd.f32 1e-06, %v3434_v14 }
0x1af4   :  { %v3438_v18 = vsel %vm3437_vm1, %v3427_v11, %v3436_v15  ;;  %4266 = vrcp.f32 %v3446_v16 }
0x1af5   :  { %v3441_v51 = vsel %vm3439_vm2, %v3440_v17, %v3438_v18 }
0x1af6   :  { %v3447_v20 = vadd.f32 1e-06, %v3441_v51 }
0x1af8   :  { %4268 = vrcp.f32 %v3447_v20 }
0x1afe   :  { %v4267_v24 = vpop.eup %4266 }
0x1aff   :  { %v3449_v27 = vmul.f32 %v4267_v24, %v3444_v23 }
0x1b01   :  { %v3454_v48 = vadd.f32 %v3453_v25, %v3449_v27 }
0x1b02   :  { %v4269_v30 = vpop.eup %4268 }
0x1b03   :  { %v3451_v31 = vmul.f32 %v4269_v30, %v3445_v28  ;;  %4077 = vmatprep.mubr.msk.f32.mxu1 %vm80_vm0, %v3454_v48 }
0x1b05   :  { %v3455_v32 = vadd.f32 %v3453_v25, %v3451_v31 }
0x1b07   :  { %4078 = vmatmul.mubr.msk.f32.vlgmr.msra.gmra.mrb[40].mxu1 %vm80_vm0, %v3455_v32 }
0x1bda   :  { %v4079_v37 = vpop.f32.mrb[40].mxu1 }
0x1bdb   :  { %v3545_v19 = vadd.f32 %v4079_v37, %v3738_v36  ;;  %v3539_v38 = vpop.f32.mrb[41].mxu1 }
0x1bdc   :  { %v3540_v45 = vadd.f32 %v3738_v36, %v3539_v38 }
0x1bdd   :  { %v3549_v42 = vmax.f32 %v3545_v19, 0.0 }
0x1bde   :  { %v3548_v39 = vmax.f32 %v3540_v45, 0.0 }
0x1be0   :  { %4096 = vmatprep.mubr.msk.f32.mxu0 %vm3558_vm3, %v3548_v39 }
0x1be1   :  { %4097 = vmatmul.mubr.msk.f32.vlgmr.msra.gmra.mrb[34].mxu0 %vm3558_vm3, %v3549_v42 }
0x1cb4   :  { %v4098_v43 = vpop.f32.mrb[34].mxu0 }
0x1cb5   :  { %v3641_v50 = vadd.f32 %v4098_v43, %v4926_v41  ;;  %v3631_v52 = vpop.f32.mrb[35].mxu0 }
0x1cb6   :  { %v3640_v53 = vadd.f32 %v3631_v52, %v4928_v22 }
0x1cb7   :  { %v3650_v47 = vadd.f32 %v3743_v44, %v3641_v50 }
0x1cb8   :  { %v3649_v29 = vadd.f32 %v3743_v44, %v3640_v53 }
0x1cb9   :  { %3652 = vst.msk [vmem:[#allocation5 + $0x8] sm:$0xff] %vm80_vm0, %v3650_v47 }
0x1cba   :  { %3651 = vst.msk [vmem:[#allocation5] sm:$0xff] %vm80_vm0, %v3649_v29 }
0x1cbb   :  { %4293 = shalt.err (!%p4290_p9)
}
0x1cbc   :  { %s4294_s3 = scalar_lea.hbm %s5023_s19, 256 }
0x1cbd   :  { %p4295_p10 = scmp.ne.s32.totalorder %s5023_s19, %s4294_s3  ;;  %p4298_p11 = scmp.lt.u32.totalorder %s4294_s3, %s5023_s19 }
0x1cbf   :  { %p4300_p12 = pnand %p4298_p11, %p4295_p10 }
0x1cc1   :  { %4303 = shalt.err (!%p4300_p12)
}
0x1cc2   :  { %s4326_s25 = smov 128  }
0x1cc3   :  { %3664 = dma.vmem_to_hbm [thread:$0]  %s3659_s29, 256, %s5023_s19, [#allocation3], %s4326_s25, %s4326_s25, %s4322_s21  }
0x1cc4   :  { %4306 = dma.done.wait [#allocation3], 256  }
0x1cc5   :  { %4307 = vsyncadd [#allocation3], 4294967040 }
0x1cc6   :  { %3668 = vsyncpa [#allocation3], 1 }
0x1cc7   :  { %3669 = vsyncpa [#allocation4], 1 }

</bundles_post_ra>
